<compile_context>
chip_gen: v7x
topology: tpu7x:2x2x1
jax: 0.10.0
libtpu: 0.0.40
codegen_flags: <defaults>
</compile_context>

<pallas_src>
import math
from functools import partial, reduce

import jax
import jax.numpy as jnp
from jax.experimental import pallas as pl
from jax.experimental.pallas import tpu as pltpu


COMPUTE_DTYPE = jnp.bfloat16   # MXU operand dtype (accumulation stays f32)


def _round_up(x: int, m: int) -> int:
    return (x + m - 1) // m * m


# --------------------------------------------------------------------------- #
# K-stage (one-shot): k = RMSNorm(v2 @ wk^T) * gk, packed into block-diagonal
#   K_big[h1*hd + d, (h1*nh + h2)*B2p + b2] = k[b2, h2*hd + d]   (zero elsewhere)
# so the Q-stage does one full-H contraction and the result is already in the
# lane-dense output order.
# --------------------------------------------------------------------------- #
def _make_k_kernel(num_heads: int, head_dim: int, b2p: int, eps: float):
    nh, hd = num_heads, head_dim

    def kernel(v2_ref, wkT_ref, gk_ref, kbig_ref):
        k = jnp.dot(v2_ref[...], wkT_ref[...],
                    preferred_element_type=jnp.float32)            # (B2p, H) f32
        # RMSNorm over the FULL hidden dim (as in the PyTorch module)
        k = k * jax.lax.rsqrt(jnp.mean(k * k, axis=-1, keepdims=True) + eps)
        k = k * gk_ref[...]
        kT = k.T                                                   # (H, B2p), once
        # head blocks side by side: kflatT[d, h2*B2p + b2] = k[b2, h2*hd + d]
        kflatT = jnp.concatenate(
            [kT[h * hd:(h + 1) * hd, :] for h in range(nh)], axis=1
        ).astype(kbig_ref.dtype)                                   # (hd, nh*B2p)
        kbig_ref[...] = jnp.zeros_like(kbig_ref)
        for h1 in range(nh):
            kbig_ref[h1 * hd:(h1 + 1) * hd,
                     h1 * nh * b2p:(h1 + 1) * nh * b2p] = kflatT

    return kernel


# --------------------------------------------------------------------------- #
# Q-stage: per B1 tile — projection + RMSNorm + one fused score matmul +
# softmax over key heads, stored block-by-block (lane-aligned, no repack).
# --------------------------------------------------------------------------- #
def _make_q_kernel(num_heads: int, b2p: int, eps: float):
    nh = num_heads

    def kernel(v1_ref, wqT_ref, gq_ref, kbig_ref, out_ref):
        q = jnp.dot(v1_ref[...], wqT_ref[...],
                    preferred_element_type=jnp.float32)            # (tb1, H) f32
        q = q * jax.lax.rsqrt(jnp.mean(q * q, axis=-1, keepdims=True) + eps)
        q = q * gq_ref[...]                    # gq pre-scaled by 1/sqrt(head_dim)
        # single fused score matmul over the FULL hidden dim (block-diag K_big);
        # columns land in (h1, h2, b2) lane-dense output order.
        s = jnp.dot(q.astype(kbig_ref.dtype), kbig_ref[...],
                    preferred_element_type=jnp.float32)            # (tb1, nh*nh*B2p)
        # softmax over key heads h2: nh lane-aligned blocks of width B2p per h1;
        # each normalized block is stored directly (no intermediate concat).
        for h1 in range(nh):
            base = h1 * nh * b2p
            blocks = [s[:, base + h2 * b2p: base + (h2 + 1) * b2p]
                      for h2 in range(nh)]
            m = reduce(jnp.maximum, blocks)
            es = [jnp.exp(b - m) for b in blocks]
            inv = pl.reciprocal(reduce(jnp.add, es), approx=True)  # EUP slot
            for h2 in range(nh):
                out_ref[:, base + h2 * b2p: base + (h2 + 1) * b2p] = es[h2] * inv

    return kernel


@partial(jax.jit, static_argnames=("num_heads", "eps"))
def cross_attention_forward(v1, v2, wq, wk, gq, gk, *, num_heads, eps=1e-6):
    """v1: (B1, H), v2: (B2, H); wq/wk: (H, H) torch-Linear layout (out, in);
    gq/gk: (H,) RMSNorm gains.  Returns (B1, B2, num_heads, num_heads), or
    (B1, B2) when num_heads == 1 (matching the PyTorch squeeze)."""
    B1, H = v1.shape
    B2, H2 = v2.shape
    assert H == H2 and H % num_heads == 0
    nh = num_heads
    hd = H // nh
    scale = 1.0 / math.sqrt(hd)

    # ---- padding ----------------------------------------------------------- #
    # B2 padded to a lane multiple so every softmax slice / output store is a
    # whole-vreg (unmasked) op.  Padded B2 columns / B1 rows stay
    # row-independent through proj, RMSNorm, scores and softmax-over-heads (the
    # softmax axis is h2, never b2) and are sliced off at the end.
    B2p = _round_up(B2, 128)
    out_w = nh * nh * B2p

    # B1 tile: >= 2 grid steps when B1 allows it (v7x megacore); live f32 score
    # slab (tb1 x out_w, ~3 copies) bounded to a few MiB.
    tb1 = min(256, _round_up(B1, 8))
    if B1 <= 512:
        tb1 = min(tb1, _round_up(max((B1 + 1) // 2, 1), 8))
    slab_rows = max(8, ((4 << 20) // (out_w * 4)) // 8 * 8)
    tb1 = max(8, min(tb1, slab_rows))
    B1p = _round_up(B1, tb1)

    v1p = jnp.pad(v1, ((0, B1p - B1), (0, 0))) if B1p != B1 else v1
    v2p = jnp.pad(v2, ((0, B2p - B2), (0, 0))) if B2p != B2 else v2

    # ---- MXU operands in bf16; post-matmul math stays f32 ------------------- #
    v1b = v1p.astype(COMPUTE_DTYPE)
    v2b = v2p.astype(COMPUTE_DTYPE)
    wqTb = wq.T.astype(COMPUTE_DTYPE)
    wkTb = wk.T.astype(COMPUTE_DTYPE)
    gq2 = (gq.astype(jnp.float32) * scale).reshape(1, H)   # fold 1/sqrt(hd)
    gk2 = gk.astype(jnp.float32).reshape(1, H)

    # ---- K-stage: computed ONCE, never per B1 tile --------------------------- #
    # TODO(synk): for very large H / B2, tile this stage and stream (H_tile, H)
    # weight blocks with a K-axis "arbitrary" grid + f32 accumulator instead of
    # whole-array VMEM blocks (needed on v7x's 64 MiB VMEM around H~2-4k).
    kbig = pl.pallas_call(
        _make_k_kernel(nh, hd, B2p, eps),
        out_shape=jax.ShapeDtypeStruct((H, out_w), COMPUTE_DTYPE),
    )(v2b, wkTb, gk2)

    # ---- Q-stage: grid over B1 tiles ----------------------------------------- #
    grid = (B1p // tb1,)
    resident = H * H * 2 + H * 4 + H * out_w * 2              # wq^T, gq, K_big
    streamed = 2 * tb1 * H * 2 + 2 * tb1 * out_w * 4          # v1 / out tiles (x2 buf)
    live_slab = 3 * tb1 * out_w * 4 + 2 * tb1 * H * 4         # s / exp blocks / q
    vmem_limit = int(min(max(2 * (resident + streamed + live_slab), 32 << 20),
                         64 << 20))
    cost = pl.CostEstimate(
        flops=2 * B1p * H * H + 2 * B1p * H * out_w,
        transcendentals=B1p * out_w + B1p,
        bytes_accessed=(B1p * H * 2 + H * H * 2 + H * 4
                        + H * out_w * 2 + B1p * out_w * 4),
    )
    resident_buf = pl.Buffered(1)     # single-buffer constant-index residents

    out = pl.pallas_call(
        _make_q_kernel(nh, B2p, eps),
        out_shape=jax.ShapeDtypeStruct((B1p, out_w), jnp.float32),
        grid=grid,
        in_specs=[
            pl.BlockSpec((tb1, H), lambda i: (i, 0)),                  # v1 tile (pipelined)
            pl.BlockSpec((H, H), lambda i: (0, 0),
                         pipeline_mode=resident_buf),                  # wq^T resident
            pl.BlockSpec((1, H), lambda i: (0, 0),
                         pipeline_mode=resident_buf),                  # gq * scale
            pl.BlockSpec((H, out_w), lambda i: (0, 0),
                         pipeline_mode=resident_buf),                  # K_big resident
        ],
        out_specs=pl.BlockSpec((tb1, out_w), lambda i: (i, 0)),
        compiler_params=pltpu.CompilerParams(
            dimension_semantics=("parallel",),
            vmem_limit_bytes=vmem_limit,
        ),
        cost_estimate=cost,
    )(v1b, wqTb, gq2, kbig)

    # out[b1, (h1*nh + h2)*B2p + b2]  ->  (B1, B2, h1, h2)
    attn = out.reshape(B1p, nh, nh, B2p)
    attn = jnp.transpose(attn, (0, 3, 1, 2))[:B1, :B2]
    if nh == 1:
        attn = attn[..., 0, 0]                 # PyTorch's squeeze(-1).squeeze(-1)
    return attn


def _reference(v1, v2, wq, wk, gq, gk, num_heads, eps=1e-6):
    """Pure-JAX f32 reference mirroring the PyTorch forward."""
    def rmsnorm(x, g):
        xf = x.astype(jnp.float32)
        var = jnp.mean(xf * xf, axis=-1, keepdims=True)
        return g * (xf * jax.lax.rsqrt(var + eps))

    B1, H = v1.shape
    B2 = v2.shape[0]
    hd = H // num_heads
    q = rmsnorm(v1 @ wq.T, gq)
    k = rmsnorm(v2 @ wk.T, gk)
    qh = q.reshape(B1, num_heads, hd)
    kh = k.reshape(B2, num_heads, hd)
    s = jnp.einsum('ahd,bgd->abhg', qh, kh) / math.sqrt(hd)
    p = jax.nn.softmax(s, axis=-1)
    if num_heads == 1:
        p = p[..., 0, 0]
    return p


if __name__ == "__main__":
    # Small config consistent with the module: hidden=128, heads=4, head_dim=32
    B1, B2, H, NH = 8, 16, 128, 4
    key = jax.random.PRNGKey(0)
    k1, k2, k3, k4 = jax.random.split(key, 4)

    vectors_1 = jax.random.normal(k1, (B1, H), jnp.float32)
    vectors_2 = jax.random.normal(k2, (B2, H), jnp.float32)
    # deterministic "xavier-ish" init for the two Linears (torch layout (out, in))
    wq = jax.random.normal(k3, (H, H), jnp.float32) * (1.0 / math.sqrt(H))
    wk = jax.random.normal(k4, (H, H), jnp.float32) * (1.0 / math.sqrt(H))
    # RMSNorm weights initialized to ones, as in the module __init__
    gq = jnp.ones((H,), jnp.float32)
    gk = jnp.ones((H,), jnp.float32)

    out = cross_attention_forward(vectors_1, vectors_2, wq, wk, gq, gk,
                                  num_heads=NH)
    out = jax.block_until_ready(out)

    ref = _reference(vectors_1, vectors_2, wq, wk, gq, gk, NH)
    assert out.shape == (B1, B2, NH, NH), out.shape
    # tolerance accounts for bf16 MXU operands (per perf review) and
    # pl.reciprocal(approx=True) in the softmax denominator
    max_err = float(jnp.max(jnp.abs(out - ref)))
    assert max_err < 2e-2, f"max abs err vs reference: {max_err}"
    print("KERNEL_OK")
</pallas_src>

<mosaic_0001>
module attributes {stable_mosaic.version = 11 : i64} {
  func.func @kernel(%arg0: memref<128x128xbf16, #tpu.memory_space<vmem>>, %arg1: memref<128x128xbf16, #tpu.memory_space<vmem>>, %arg2: memref<1x128xf32, #tpu.memory_space<vmem>>, %arg3: memref<128x2048xbf16, #tpu.memory_space<vmem>>) attributes {dimension_semantics = [], scalar_prefetch = 0 : i64, scratch_operands = 0 : i64, tpu.core_type = #tpu.core_type<tc>} {
    %c0 = arith.constant 0 : index
    %c0_0 = arith.constant 0 : index
    %0 = vector.load %arg0[%c0, %c0_0] : memref<128x128xbf16, #tpu.memory_space<vmem>>, vector<128x128xbf16>
    %c0_1 = arith.constant 0 : index
    %c0_2 = arith.constant 0 : index
    %1 = vector.load %arg1[%c0_1, %c0_2] : memref<128x128xbf16, #tpu.memory_space<vmem>>, vector<128x128xbf16>
    %cst = arith.constant dense<0.000000e+00> : vector<128x128xf32>
    %2 = tpu.matmul %0, %1, %cst {dimension_numbers = #tpu.dot_dimension_numbers<[1], [0], [0], [1], [0, 0, 1, 1], [], []>} : vector<128x128xbf16>, vector<128x128xbf16>, vector<128x128xf32> -> vector<128x128xf32>
    %3 = arith.mulf %2, %2 : vector<128x128xf32>
    %cst_3 = arith.constant dense<0.000000e+00> : vector<128xf32>
    %4 = vector.multi_reduction <add>, %3, %cst_3 [1] : vector<128x128xf32> to vector<128xf32>
    %5 = vector.shape_cast %4 : vector<128xf32> to vector<128x1xf32>
    %cst_4 = arith.constant 1.280000e+02 : f32
    %6 = vector.broadcast %cst_4 : f32 to vector<128x1xf32>
    %7 = arith.divf %5, %6 : vector<128x1xf32>
    %cst_5 = arith.constant 9.99999997E-7 : f32
    %8 = vector.broadcast %cst_5 : f32 to vector<128x1xf32>
    %9 = arith.addf %7, %8 : vector<128x1xf32>
    %10 = math.rsqrt %9 : vector<128x1xf32>
    %11 = vector.broadcast %10 : vector<128x1xf32> to vector<128x128xf32>
    %12 = arith.mulf %2, %11 : vector<128x128xf32>
    %c0_6 = arith.constant 0 : index
    %c0_7 = arith.constant 0 : index
    %13 = vector.load %arg2[%c0_6, %c0_7] : memref<1x128xf32, #tpu.memory_space<vmem>>, vector<1x128xf32>
    %14 = vector.broadcast %13 : vector<1x128xf32> to vector<128x128xf32>
    %15 = arith.mulf %12, %14 : vector<128x128xf32>
    %16 = tpu.transpose %15, [1, 0] : vector<128x128xf32> -> vector<128x128xf32>
    %17 = vector.extract_strided_slice %16 {offsets = [0, 0], sizes = [32, 128], strides = [1, 1]} : vector<128x128xf32> to vector<32x128xf32>
    %18 = vector.extract_strided_slice %16 {offsets = [32, 0], sizes = [32, 128], strides = [1, 1]} : vector<128x128xf32> to vector<32x128xf32>
    %19 = vector.extract_strided_slice %16 {offsets = [64, 0], sizes = [32, 128], strides = [1, 1]} : vector<128x128xf32> to vector<32x128xf32>
    %20 = vector.extract_strided_slice %16 {offsets = [96, 0], sizes = [32, 128], strides = [1, 1]} : vector<128x128xf32> to vector<32x128xf32>
    %21 = tpu.concatenate %17, %18, %19, %20 in 1 : vector<32x128xf32>, vector<32x128xf32>, vector<32x128xf32>, vector<32x128xf32> -> vector<32x512xf32>
    %22 = arith.truncf %21 : vector<32x512xf32> to vector<32x512xbf16>
    %cst_8 = arith.constant 0.000000e+00 : bf16
    %23 = vector.broadcast %cst_8 : bf16 to vector<128x2048xbf16>
    %c0_9 = arith.constant 0 : index
    %c0_10 = arith.constant 0 : index
    %24 = vector.load %arg3[%c0_9, %c0_10] : memref<128x2048xbf16, #tpu.memory_space<vmem>>, vector<128x2048xbf16>
    tpu.vector_store %arg3[%c0_9, %c0_10], %23 {strides = array<i32>} : memref<128x2048xbf16, #tpu.memory_space<vmem>>, vector<128x2048xbf16>,
    %c0_11 = arith.constant 0 : index
    %c0_12 = arith.constant 0 : index
    %25 = vector.load %arg3[%c0_11, %c0_12] : memref<128x2048xbf16, #tpu.memory_space<vmem>>, vector<32x512xbf16>
    tpu.vector_store %arg3[%c0_11, %c0_12], %22 {strides = array<i32>} : memref<128x2048xbf16, #tpu.memory_space<vmem>>, vector<32x512xbf16>,
    %c32 = arith.constant 32 : index
    %c512 = arith.constant 512 : index
    %26 = vector.load %arg3[%c32, %c512] : memref<128x2048xbf16, #tpu.memory_space<vmem>>, vector<32x512xbf16>
    tpu.vector_store %arg3[%c32, %c512], %22 {strides = array<i32>} : memref<128x2048xbf16, #tpu.memory_space<vmem>>, vector<32x512xbf16>,
    %c64 = arith.constant 64 : index
    %c1024 = arith.constant 1024 : index
    %27 = vector.load %arg3[%c64, %c1024] : memref<128x2048xbf16, #tpu.memory_space<vmem>>, vector<32x512xbf16>
    tpu.vector_store %arg3[%c64, %c1024], %22 {strides = array<i32>} : memref<128x2048xbf16, #tpu.memory_space<vmem>>, vector<32x512xbf16>,
    %c96 = arith.constant 96 : index
    %c1536 = arith.constant 1536 : index
    %28 = vector.load %arg3[%c96, %c1536] : memref<128x2048xbf16, #tpu.memory_space<vmem>>, vector<32x512xbf16>
    tpu.vector_store %arg3[%c96, %c1536], %22 {strides = array<i32>} : memref<128x2048xbf16, #tpu.memory_space<vmem>>, vector<32x512xbf16>,
    return
  }
}

module attributes {stable_mosaic.version = 11 : i64} {
  func.func @kernel(%arg0: i32, %arg1: memref<8x128xbf16, #tpu.memory_space<vmem>>, %arg2: memref<128x128xbf16, #tpu.memory_space<vmem>>, %arg3: memref<1x128xf32, #tpu.memory_space<vmem>>, %arg4: memref<128x2048xbf16, #tpu.memory_space<vmem>>, %arg5: memref<8x2048xf32, #tpu.memory_space<vmem>>) attributes {dimension_semantics = [#tpu.dimension_semantics<parallel>], iteration_bounds = array<i64: 1>, scalar_prefetch = 0 : i64, scratch_operands = 0 : i64, tpu.core_type = #tpu.core_type<tc>, window_params = [{transform_indices = @transform_0, window_bounds = array<i64: 8, 128>}, {pipeline_mode = #tpu.pipeline_mode<synchronous>, transform_indices = @transform_1, window_bounds = array<i64: 128, 128>}, {pipeline_mode = #tpu.pipeline_mode<synchronous>, transform_indices = @transform_2, window_bounds = array<i64: 1, 128>}, {pipeline_mode = #tpu.pipeline_mode<synchronous>, transform_indices = @transform_3, window_bounds = array<i64: 128, 2048>}, {transform_indices = @transform_4, window_bounds = array<i64: 8, 2048>}]} {
    %c0 = arith.constant 0 : index
    %c0_0 = arith.constant 0 : index
    %0 = vector.load %arg1[%c0, %c0_0] : memref<8x128xbf16, #tpu.memory_space<vmem>>, vector<8x128xbf16>
    %c0_1 = arith.constant 0 : index
    %c0_2 = arith.constant 0 : index
    %1 = vector.load %arg2[%c0_1, %c0_2] : memref<128x128xbf16, #tpu.memory_space<vmem>>, vector<128x128xbf16>
    %cst = arith.constant dense<0.000000e+00> : vector<8x128xf32>
    %2 = tpu.matmul %0, %1, %cst {dimension_numbers = #tpu.dot_dimension_numbers<[1], [0], [0], [1], [0, 0, 1, 1], [], []>} : vector<8x128xbf16>, vector<128x128xbf16>, vector<8x128xf32> -> vector<8x128xf32>
    %3 = arith.mulf %2, %2 : vector<8x128xf32>
    %cst_3 = arith.constant dense<0.000000e+00> : vector<8xf32>
    %4 = vector.multi_reduction <add>, %3, %cst_3 [1] : vector<8x128xf32> to vector<8xf32>
    %5 = vector.shape_cast %4 : vector<8xf32> to vector<8x1xf32>
    %cst_4 = arith.constant 1.280000e+02 : f32
    %6 = vector.broadcast %cst_4 : f32 to vector<8x1xf32>
    %7 = arith.divf %5, %6 : vector<8x1xf32>
    %cst_5 = arith.constant 9.99999997E-7 : f32
    %8 = vector.broadcast %cst_5 : f32 to vector<8x1xf32>
    %9 = arith.addf %7, %8 : vector<8x1xf32>
    %10 = math.rsqrt %9 : vector<8x1xf32>
    %11 = vector.broadcast %10 : vector<8x1xf32> to vector<8x128xf32>
    %12 = arith.mulf %2, %11 : vector<8x128xf32>
    %c0_6 = arith.constant 0 : index
    %c0_7 = arith.constant 0 : index
    %13 = vector.load %arg3[%c0_6, %c0_7] : memref<1x128xf32, #tpu.memory_space<vmem>>, vector<1x128xf32>
    %14 = vector.broadcast %13 : vector<1x128xf32> to vector<8x128xf32>
    %15 = arith.mulf %12, %14 : vector<8x128xf32>
    %16 = arith.truncf %15 : vector<8x128xf32> to vector<8x128xbf16>
    %c0_8 = arith.constant 0 : index
    %c0_9 = arith.constant 0 : index
    %17 = vector.load %arg4[%c0_8, %c0_9] : memref<128x2048xbf16, #tpu.memory_space<vmem>>, vector<128x2048xbf16>
    %cst_10 = arith.constant dense<0.000000e+00> : vector<8x2048xf32>
    %18 = tpu.matmul %16, %17, %cst_10 {dimension_numbers = #tpu.dot_dimension_numbers<[1], [0], [0], [1], [0, 0, 1, 1], [], []>} : vector<8x128xbf16>, vector<128x2048xbf16>, vector<8x2048xf32> -> vector<8x2048xf32>
    %19 = vector.extract_strided_slice %18 {offsets = [0, 0], sizes = [8, 128], strides = [1, 1]} : vector<8x2048xf32> to vector<8x128xf32>
    %20 = vector.extract_strided_slice %18 {offsets = [0, 128], sizes = [8, 128], strides = [1, 1]} : vector<8x2048xf32> to vector<8x128xf32>
    %21 = vector.extract_strided_slice %18 {offsets = [0, 256], sizes = [8, 128], strides = [1, 1]} : vector<8x2048xf32> to vector<8x128xf32>
    %22 = vector.extract_strided_slice %18 {offsets = [0, 384], sizes = [8, 128], strides = [1, 1]} : vector<8x2048xf32> to vector<8x128xf32>
    %23 = arith.maximumf %19, %20 : vector<8x128xf32>
    %24 = arith.maximumf %23, %21 : vector<8x128xf32>
    %25 = arith.maximumf %24, %22 : vector<8x128xf32>
    %26 = arith.subf %19, %25 : vector<8x128xf32>
    %27 = math.exp %26 : vector<8x128xf32>
    %28 = arith.subf %20, %25 : vector<8x128xf32>
    %29 = math.exp %28 : vector<8x128xf32>
    %30 = arith.subf %21, %25 : vector<8x128xf32>
    %31 = math.exp %30 : vector<8x128xf32>
    %32 = arith.subf %22, %25 : vector<8x128xf32>
    %33 = math.exp %32 : vector<8x128xf32>
    %34 = arith.addf %27, %29 : vector<8x128xf32>
    %35 = arith.addf %34, %31 : vector<8x128xf32>
    %36 = arith.addf %35, %33 : vector<8x128xf32>
    %37 = tpu.reciprocal %36 {approx = true} : vector<8x128xf32> -> vector<8x128xf32>
    %38 = arith.mulf %27, %37 : vector<8x128xf32>
    %c0_11 = arith.constant 0 : index
    %c0_12 = arith.constant 0 : index
    %39 = vector.load %arg5[%c0_11, %c0_12] : memref<8x2048xf32, #tpu.memory_space<vmem>>, vector<8x128xf32>
    tpu.vector_store %arg5[%c0_11, %c0_12], %38 {strides = array<i32>} : memref<8x2048xf32, #tpu.memory_space<vmem>>, vector<8x128xf32>,
    %40 = arith.mulf %29, %37 : vector<8x128xf32>
    %c0_13 = arith.constant 0 : index
    %c128 = arith.constant 128 : index
    %41 = vector.load %arg5[%c0_13, %c128] : memref<8x2048xf32, #tpu.memory_space<vmem>>, vector<8x128xf32>
    tpu.vector_store %arg5[%c0_13, %c128], %40 {strides = array<i32>} : memref<8x2048xf32, #tpu.memory_space<vmem>>, vector<8x128xf32>,
    %42 = arith.mulf %31, %37 : vector<8x128xf32>
    %c0_14 = arith.constant 0 : index
    %c256 = arith.constant 256 : index
    %43 = vector.load %arg5[%c0_14, %c256] : memref<8x2048xf32, #tpu.memory_space<vmem>>, vector<8x128xf32>
    tpu.vector_store %arg5[%c0_14, %c256], %42 {strides = array<i32>} : memref<8x2048xf32, #tpu.memory_space<vmem>>, vector<8x128xf32>,
    %44 = arith.mulf %33, %37 : vector<8x128xf32>
    %c0_15 = arith.constant 0 : index
    %c384 = arith.constant 384 : index
    %45 = vector.load %arg5[%c0_15, %c384] : memref<8x2048xf32, #tpu.memory_space<vmem>>, vector<8x128xf32>
    tpu.vector_store %arg5[%c0_15, %c384], %44 {strides = array<i32>} : memref<8x2048xf32, #tpu.memory_space<vmem>>, vector<8x128xf32>,
    %46 = vector.extract_strided_slice %18 {offsets = [0, 512], sizes = [8, 128], strides = [1, 1]} : vector<8x2048xf32> to vector<8x128xf32>
    %47 = vector.extract_strided_slice %18 {offsets = [0, 640], sizes = [8, 128], strides = [1, 1]} : vector<8x2048xf32> to vector<8x128xf32>
    %48 = vector.extract_strided_slice %18 {offsets = [0, 768], sizes = [8, 128], strides = [1, 1]} : vector<8x2048xf32> to vector<8x128xf32>
    %49 = vector.extract_strided_slice %18 {offsets = [0, 896], sizes = [8, 128], strides = [1, 1]} : vector<8x2048xf32> to vector<8x128xf32>
    %50 = arith.maximumf %46, %47 : vector<8x128xf32>
    %51 = arith.maximumf %50, %48 : vector<8x128xf32>
    %52 = arith.maximumf %51, %49 : vector<8x128xf32>
    %53 = arith.subf %46, %52 : vector<8x128xf32>
    %54 = math.exp %53 : vector<8x128xf32>
    %55 = arith.subf %47, %52 : vector<8x128xf32>
    %56 = math.exp %55 : vector<8x128xf32>
    %57 = arith.subf %48, %52 : vector<8x128xf32>
    %58 = math.exp %57 : vector<8x128xf32>
    %59 = arith.subf %49, %52 : vector<8x128xf32>
    %60 = math.exp %59 : vector<8x128xf32>
    %61 = arith.addf %54, %56 : vector<8x128xf32>
    %62 = arith.addf %61, %58 : vector<8x128xf32>
    %63 = arith.addf %62, %60 : vector<8x128xf32>
    %64 = tpu.reciprocal %63 {approx = true} : vector<8x128xf32> -> vector<8x128xf32>
    %65 = arith.mulf %54, %64 : vector<8x128xf32>
    %c0_16 = arith.constant 0 : index
    %c512 = arith.constant 512 : index
    %66 = vector.load %arg5[%c0_16, %c512] : memref<8x2048xf32, #tpu.memory_space<vmem>>, vector<8x128xf32>
    tpu.vector_store %arg5[%c0_16, %c512], %65 {strides = array<i32>} : memref<8x2048xf32, #tpu.memory_space<vmem>>, vector<8x128xf32>,
    %67 = arith.mulf %56, %64 : vector<8x128xf32>
    %c0_17 = arith.constant 0 : index
    %c640 = arith.constant 640 : index
    %68 = vector.load %arg5[%c0_17, %c640] : memref<8x2048xf32, #tpu.memory_space<vmem>>, vector<8x128xf32>
    tpu.vector_store %arg5[%c0_17, %c640], %67 {strides = array<i32>} : memref<8x2048xf32, #tpu.memory_space<vmem>>, vector<8x128xf32>,
    %69 = arith.mulf %58, %64 : vector<8x128xf32>
    %c0_18 = arith.constant 0 : index
    %c768 = arith.constant 768 : index
    %70 = vector.load %arg5[%c0_18, %c768] : memref<8x2048xf32, #tpu.memory_space<vmem>>, vector<8x128xf32>
    tpu.vector_store %arg5[%c0_18, %c768], %69 {strides = array<i32>} : memref<8x2048xf32, #tpu.memory_space<vmem>>, vector<8x128xf32>,
    %71 = arith.mulf %60, %64 : vector<8x128xf32>
    %c0_19 = arith.constant 0 : index
    %c896 = arith.constant 896 : index
    %72 = vector.load %arg5[%c0_19, %c896] : memref<8x2048xf32, #tpu.memory_space<vmem>>, vector<8x128xf32>
    tpu.vector_store %arg5[%c0_19, %c896], %71 {strides = array<i32>} : memref<8x2048xf32, #tpu.memory_space<vmem>>, vector<8x128xf32>,
    %73 = vector.extract_strided_slice %18 {offsets = [0, 1024], sizes = [8, 128], strides = [1, 1]} : vector<8x2048xf32> to vector<8x128xf32>
    %74 = vector.extract_strided_slice %18 {offsets = [0, 1152], sizes = [8, 128], strides = [1, 1]} : vector<8x2048xf32> to vector<8x128xf32>
    %75 = vector.extract_strided_slice %18 {offsets = [0, 1280], sizes = [8, 128], strides = [1, 1]} : vector<8x2048xf32> to vector<8x128xf32>
    %76 = vector.extract_strided_slice %18 {offsets = [0, 1408], sizes = [8, 128], strides = [1, 1]} : vector<8x2048xf32> to vector<8x128xf32>
    %77 = arith.maximumf %73, %74 : vector<8x128xf32>
    %78 = arith.maximumf %77, %75 : vector<8x128xf32>
    %79 = arith.maximumf %78, %76 : vector<8x128xf32>
    %80 = arith.subf %73, %79 : vector<8x128xf32>
    %81 = math.exp %80 : vector<8x128xf32>
    %82 = arith.subf %74, %79 : vector<8x128xf32>
    %83 = math.exp %82 : vector<8x128xf32>
    %84 = arith.subf %75, %79 : vector<8x128xf32>
    %85 = math.exp %84 : vector<8x128xf32>
    %86 = arith.subf %76, %79 : vector<8x128xf32>
    %87 = math.exp %86 : vector<8x128xf32>
    %88 = arith.addf %81, %83 : vector<8x128xf32>
    %89 = arith.addf %88, %85 : vector<8x128xf32>
    %90 = arith.addf %89, %87 : vector<8x128xf32>
    %91 = tpu.reciprocal %90 {approx = true} : vector<8x128xf32> -> vector<8x128xf32>
    %92 = arith.mulf %81, %91 : vector<8x128xf32>
    %c0_20 = arith.constant 0 : index
    %c1024 = arith.constant 1024 : index
    %93 = vector.load %arg5[%c0_20, %c1024] : memref<8x2048xf32, #tpu.memory_space<vmem>>, vector<8x128xf32>
    tpu.vector_store %arg5[%c0_20, %c1024], %92 {strides = array<i32>} : memref<8x2048xf32, #tpu.memory_space<vmem>>, vector<8x128xf32>,
    %94 = arith.mulf %83, %91 : vector<8x128xf32>
    %c0_21 = arith.constant 0 : index
    %c1152 = arith.constant 1152 : index
    %95 = vector.load %arg5[%c0_21, %c1152] : memref<8x2048xf32, #tpu.memory_space<vmem>>, vector<8x128xf32>
    tpu.vector_store %arg5[%c0_21, %c1152], %94 {strides = array<i32>} : memref<8x2048xf32, #tpu.memory_space<vmem>>, vector<8x128xf32>,
    %96 = arith.mulf %85, %91 : vector<8x128xf32>
    %c0_22 = arith.constant 0 : index
    %c1280 = arith.constant 1280 : index
    %97 = vector.load %arg5[%c0_22, %c1280] : memref<8x2048xf32, #tpu.memory_space<vmem>>, vector<8x128xf32>
    tpu.vector_store %arg5[%c0_22, %c1280], %96 {strides = array<i32>} : memref<8x2048xf32, #tpu.memory_space<vmem>>, vector<8x128xf32>,
    %98 = arith.mulf %87, %91 : vector<8x128xf32>
    %c0_23 = arith.constant 0 : index
    %c1408 = arith.constant 1408 : index
    %99 = vector.load %arg5[%c0_23, %c1408] : memref<8x2048xf32, #tpu.memory_space<vmem>>, vector<8x128xf32>
    tpu.vector_store %arg5[%c0_23, %c1408], %98 {strides = array<i32>} : memref<8x2048xf32, #tpu.memory_space<vmem>>, vector<8x128xf32>,
    %100 = vector.extract_strided_slice %18 {offsets = [0, 1536], sizes = [8, 128], strides = [1, 1]} : vector<8x2048xf32> to vector<8x128xf32>
    %101 = vector.extract_strided_slice %18 {offsets = [0, 1664], sizes = [8, 128], strides = [1, 1]} : vector<8x2048xf32> to vector<8x128xf32>
    %102 = vector.extract_strided_slice %18 {offsets = [0, 1792], sizes = [8, 128], strides = [1, 1]} : vector<8x2048xf32> to vector<8x128xf32>
    %103 = vector.extract_strided_slice %18 {offsets = [0, 1920], sizes = [8, 128], strides = [1, 1]} : vector<8x2048xf32> to vector<8x128xf32>
    %104 = arith.maximumf %100, %101 : vector<8x128xf32>
    %105 = arith.maximumf %104, %102 : vector<8x128xf32>
    %106 = arith.maximumf %105, %103 : vector<8x128xf32>
    %107 = arith.subf %100, %106 : vector<8x128xf32>
    %108 = math.exp %107 : vector<8x128xf32>
    %109 = arith.subf %101, %106 : vector<8x128xf32>
    %110 = math.exp %109 : vector<8x128xf32>
    %111 = arith.subf %102, %106 : vector<8x128xf32>
    %112 = math.exp %111 : vector<8x128xf32>
    %113 = arith.subf %103, %106 : vector<8x128xf32>
    %114 = math.exp %113 : vector<8x128xf32>
    %115 = arith.addf %108, %110 : vector<8x128xf32>
    %116 = arith.addf %115, %112 : vector<8x128xf32>
    %117 = arith.addf %116, %114 : vector<8x128xf32>
    %118 = tpu.reciprocal %117 {approx = true} : vector<8x128xf32> -> vector<8x128xf32>
    %119 = arith.mulf %108, %118 : vector<8x128xf32>
    %c0_24 = arith.constant 0 : index
    %c1536 = arith.constant 1536 : index
    %120 = vector.load %arg5[%c0_24, %c1536] : memref<8x2048xf32, #tpu.memory_space<vmem>>, vector<8x128xf32>
    tpu.vector_store %arg5[%c0_24, %c1536], %119 {strides = array<i32>} : memref<8x2048xf32, #tpu.memory_space<vmem>>, vector<8x128xf32>,
    %121 = arith.mulf %110, %118 : vector<8x128xf32>
    %c0_25 = arith.constant 0 : index
    %c1664 = arith.constant 1664 : index
    %122 = vector.load %arg5[%c0_25, %c1664] : memref<8x2048xf32, #tpu.memory_space<vmem>>, vector<8x128xf32>
    tpu.vector_store %arg5[%c0_25, %c1664], %121 {strides = array<i32>} : memref<8x2048xf32, #tpu.memory_space<vmem>>, vector<8x128xf32>,
    %123 = arith.mulf %112, %118 : vector<8x128xf32>
    %c0_26 = arith.constant 0 : index
    %c1792 = arith.constant 1792 : index
    %124 = vector.load %arg5[%c0_26, %c1792] : memref<8x2048xf32, #tpu.memory_space<vmem>>, vector<8x128xf32>
    tpu.vector_store %arg5[%c0_26, %c1792], %123 {strides = array<i32>} : memref<8x2048xf32, #tpu.memory_space<vmem>>, vector<8x128xf32>,
    %125 = arith.mulf %114, %118 : vector<8x128xf32>
    %c0_27 = arith.constant 0 : index
    %c1920 = arith.constant 1920 : index
    %126 = vector.load %arg5[%c0_27, %c1920] : memref<8x2048xf32, #tpu.memory_space<vmem>>, vector<8x128xf32>
    tpu.vector_store %arg5[%c0_27, %c1920], %125 {strides = array<i32>} : memref<8x2048xf32, #tpu.memory_space<vmem>>, vector<8x128xf32>,
    return
  }
  func.func @transform_0(%arg0: i32) -> (i32, i32) {
    %c0_i32 = arith.constant 0 : i32
    %c0_i32_0 = arith.constant 0 : i32
    return %arg0, %c0_i32 : i32, i32
  }
  func.func @transform_1(%arg0: i32) -> (i32, i32) {
    %c0_i32 = arith.constant 0 : i32
    %c0_i32_0 = arith.constant 0 : i32
    %c0_i32_1 = arith.constant 0 : i32
    return %c0_i32, %c0_i32_0 : i32, i32
  }
  func.func @transform_2(%arg0: i32) -> (i32, i32) {
    %c0_i32 = arith.constant 0 : i32
    %c0_i32_0 = arith.constant 0 : i32
    %c0_i32_1 = arith.constant 0 : i32
    return %c0_i32, %c0_i32_0 : i32, i32
  }
  func.func @transform_3(%arg0: i32) -> (i32, i32) {
    %c0_i32 = arith.constant 0 : i32
    %c0_i32_0 = arith.constant 0 : i32
    %c0_i32_1 = arith.constant 0 : i32
    return %c0_i32, %c0_i32_0 : i32, i32
  }
  func.func @transform_4(%arg0: i32) -> (i32, i32) {
    %c0_i32 = arith.constant 0 : i32
    %c0_i32_0 = arith.constant 0 : i32
    return %arg0, %c0_i32 : i32, i32
  }
}

</mosaic_0001>

<bundles_post_ra>
// kernel: cross_attention_forward.2
= control target key start
LH: loop header
LB: loop body
LE: loop exit
PB: predicated region body
PF: predicated region fallthrough
CT: control target
= control target key end

     0   :  { %s1428_s1 = inlined_call_operand.vmem [shape: bf16[128,128], index: 1, kind: input, shape index: {}]   ;;  %s1429_s0 = inlined_call_operand.vmem [shape: bf16[128,128], index: 0, kind: input, shape index: {}]   ;;  %s1430_s2 = inlined_call_operand.vmem [shape: f32[1,128], index: 2, kind: input, shape index: {}]   ;;  %s1431_s3 = inlined_call_operand.vmem [shape: bf16[128,2048], index: 3, kind: output, shape index: {}]  }
   0x1   :  { %v718_v0 = vld [vmem:[%s1428_s1] sm:$0xff]   ;;  %v719_v1 = vld [vmem:[%s1428_s1 + $0x8] sm:$0xff]   ;;  %v720_v2 = vld [vmem:[%s1428_s1 + $0x10] sm:$0xff]  }
   0x2   :  { %669 = vmatprep.subr.bf16.mxu0 %v718_v0  ;;  %701 = vmatprep.subr.bf16.mxu1 %v718_v0  ;;  %v721_v3 = vld [vmem:[%s1428_s1 + $0x18] sm:$0xff]   ;;  %v726_v4 = vld [vmem:[%s1429_s0] sm:$0xff]   ;;  %v723_v7 = vld [vmem:[%s1428_s1 + $0x28] sm:$0xff]  }
   0x3   :  { %670 = vmatpush3.bf16.msra.mxu0 %v718_v0  ;;  %709 = vmatpush3.bf16.msra.mxu1 %v718_v0  ;;  %v722_v5 = vld [vmem:[%s1428_s1 + $0x20] sm:$0xff]   ;;  %v724_v8 = vld [vmem:[%s1428_s1 + $0x30] sm:$0xff]   ;;  %v725_v9 = vld [vmem:[%s1428_s1 + $0x38] sm:$0xff]  }
   0x4   :  { %671 = vmatprep.subr.bf16.mxu0 %v719_v1  ;;  %702 = vmatprep.subr.bf16.mxu1 %v719_v1  ;;  %v730_v6 = vld [vmem:[%s1429_s0 + $0x20] sm:$0xff]   ;;  %v727_v10 = vld [vmem:[%s1429_s0 + $0x8] sm:$0xff]   ;;  %v728_v12 = vld [vmem:[%s1429_s0 + $0x10] sm:$0xff]  }
   0x5   :  { %685 = vmatprep.mubr.bf16.mxu0 %v726_v4  ;;  %693 = vmatprep.mubr.bf16.mxu1 %v730_v6  ;;  %v731_v11 = vld [vmem:[%s1429_s0 + $0x28] sm:$0xff]   ;;  %v732_v13 = vld [vmem:[%s1429_s0 + $0x30] sm:$0xff]   ;;  %v729_v14 = vld [vmem:[%s1429_s0 + $0x18] sm:$0xff]  }
   0x6   :  { %v733_v15 = vld [vmem:[%s1429_s0 + $0x38] sm:$0xff]  }
   0x7   :  { %672 = vmatpush3.bf16.msra.mxu0 %v719_v1  ;;  %710 = vmatpush3.bf16.msra.mxu1 %v719_v1 }
   0x8   :  { %673 = vmatprep.subr.bf16.mxu0 %v720_v2  ;;  %703 = vmatprep.subr.bf16.mxu1 %v720_v2 }
   0xb   :  { %674 = vmatpush3.bf16.msra.mxu0 %v720_v2  ;;  %711 = vmatpush3.bf16.msra.mxu1 %v720_v2 }
   0xc   :  { %675 = vmatprep.subr.bf16.mxu0 %v721_v3  ;;  %704 = vmatprep.subr.bf16.mxu1 %v721_v3 }
   0xf   :  { %676 = vmatpush3.bf16.msra.mxu0 %v721_v3  ;;  %712 = vmatpush3.bf16.msra.mxu1 %v721_v3  ;;  %v902_v3 = vld [vmem:[%s1430_s2] ss:$0 sm:$0xff] }
  0x10   :  { %677 = vmatprep.subr.bf16.mxu0 %v722_v5  ;;  %705 = vmatprep.subr.bf16.mxu1 %v722_v5 }
  0x13   :  { %678 = vmatpush3.bf16.msra.mxu0 %v722_v5  ;;  %713 = vmatpush3.bf16.msra.mxu1 %v722_v5 }
  0x14   :  { %679 = vmatprep.subr.bf16.mxu0 %v723_v7  ;;  %706 = vmatprep.subr.bf16.mxu1 %v723_v7 }
  0x17   :  { %680 = vmatpush3.bf16.msra.mxu0 %v723_v7  ;;  %714 = vmatpush3.bf16.msra.mxu1 %v723_v7 }
  0x18   :  { %681 = vmatprep.subr.bf16.mxu0 %v724_v8  ;;  %707 = vmatprep.subr.bf16.mxu1 %v724_v8 }
  0x1b   :  { %682 = vmatpush3.bf16.msra.mxu0 %v724_v8  ;;  %715 = vmatpush3.bf16.msra.mxu1 %v724_v8 }
  0x1c   :  { %683 = vmatprep.subr.bf16.mxu0 %v725_v9  ;;  %708 = vmatprep.subr.bf16.mxu1 %v725_v9 }
  0x1f   :  { %684 = vmatpush3.bf16.msra.mxu0 %v725_v9  ;;  %716 = vmatpush3.bf16.msra.mxu1 %v725_v9 }
  0x22   :  { %686 = vmatmul.mubr.bf16.vlgmr.msra.gmra.mrb[0].mxu0 %v727_v10  ;;  %694 = vmatmul.mubr.bf16.vlgmr.msra.gmra.mrb[0].mxu1 %v731_v11 }
  0x23   :  { %689 = vmatprep.mubr.bf16.mxu0 %v728_v12  ;;  %697 = vmatprep.mubr.bf16.mxu1 %v732_v13 }
  0x2a   :  { %690 = vmatmul.mubr.bf16.gmra.mrb[4].mxu0 %v729_v14  ;;  %698 = vmatmul.mubr.bf16.gmra.mrb[4].mxu1 %v733_v15 }
  0xf5   :  { %v835_v16 = vpop.f32.mrb[0].mxu0  ;;  %v837_v17 = vpop.f32.mrb[0].mxu1 }
  0xf6   :  { %v839_v18 = vpop.f32.mrb[1].mxu0  ;;  %v242_v19 = vmul.f32 %v835_v16, %v835_v16  ;;  %v843_v20 = vpop.f32.mrb[1].mxu1  ;;  %v250_v42 = vmul.f32 %v837_v17, %v837_v17 }
  0xf7   :  { %v845_v21 = vpop.f32.mrb[2].mxu0  ;;  %v240_v22 = vmul.f32 %v839_v18, %v839_v18  ;;  %v849_v23 = vpop.f32.mrb[2].mxu1  ;;  %v248_v40 = vmul.f32 %v843_v20, %v843_v20 }
  0xf8   :  { %260 = vadd.xlane.f32.xlu1 %v242_v19  ;;  %v851_v24 = vpop.f32.mrb[3].mxu0  ;;  %v853_v25 = vpop.f32.mrb[3].mxu1  ;;  %v243_v26 = vmul.f32 %v845_v21, %v845_v21  ;;  %v251_v43 = vmul.f32 %v849_v23, %v849_v23 }
  0xf9   :  { %256 = vadd.xlane.f32.xlu0 %v240_v22  ;;  %v241_v27 = vmul.f32 %v851_v24, %v851_v24  ;;  %v249_v41 = vmul.f32 %v853_v25, %v853_v25 }
  0xfc   :  { %262 = vadd.xlane.f32.xlu1 %v243_v26 }
  0xfd   :  { %258 = vadd.xlane.f32.xlu0 %v241_v27  ;;  %v859_v28 = vpop.f32.mrb[4].mxu0  ;;  %v861_v29 = vpop.f32.mrb[4].mxu1 }
  0xfe   :  { %v863_v30 = vpop.f32.mrb[5].mxu0  ;;  %v246_v31 = vmul.f32 %v859_v28, %v859_v28  ;;  %v867_v32 = vpop.f32.mrb[5].mxu1  ;;  %v254_v46 = vmul.f32 %v861_v29, %v861_v29 }
  0xff   :  { %v869_v33 = vpop.f32.mrb[6].mxu0  ;;  %v871_v34 = vpop.f32.mrb[6].mxu1  ;;  %v244_v38 = vmul.f32 %v863_v30, %v863_v30  ;;  %v252_v44 = vmul.f32 %v867_v32, %v867_v32 }
 0x100   :  { %v873_v35 = vpop.f32.mrb[7].mxu0  ;;  %v875_v36 = vpop.f32.mrb[7].mxu1  ;;  %v247_v39 = vmul.f32 %v869_v33, %v869_v33  ;;  %v255_v47 = vmul.f32 %v871_v34, %v871_v34 }
 0x101   :  { %v245_v37 = vmul.f32 %v873_v35, %v873_v35  ;;  %268 = vadd.xlane.f32.xlu0 %v246_v31  ;;  %v253_v45 = vmul.f32 %v875_v36, %v875_v36 }
 0x103   :  { %266 = vadd.xlane.f32.xlu1 %v245_v37 }
 0x105   :  { %264 = vadd.xlane.f32.xlu0 %v244_v38 }
 0x107   :  { %270 = vadd.xlane.f32.xlu1 %v247_v39 }
 0x109   :  { %272 = vadd.xlane.f32.xlu0 %v248_v40 }
 0x10b   :  { %274 = vadd.xlane.f32.xlu1 %v249_v41 }
 0x10d   :  { %276 = vadd.xlane.f32.xlu0 %v250_v42 }
 0x10f   :  { %278 = vadd.xlane.f32.xlu1 %v251_v43 }
 0x111   :  { %280 = vadd.xlane.f32.xlu0 %v252_v44 }
 0x113   :  { %282 = vadd.xlane.f32.xlu1 %v253_v45 }
 0x115   :  { %284 = vadd.xlane.f32.xlu0 %v254_v46 }
 0x117   :  { %286 = vadd.xlane.f32.xlu1 %v255_v47 }
 0x185   :  { %v261_v48 = vpop.xlane.xlu1 %260 }
 0x186   :  { %v291_v49 = vmul.f32 0.0078125, %v261_v48  ;;  %v257_v50 = vpop.xlane.xlu0 %256 }
 0x187   :  { %v289_v51 = vmul.f32 0.0078125, %v257_v50 }
 0x188   :  { %v307_v54 = vadd.f32 1e-06, %v291_v49 }
 0x189   :  { %v305_v52 = vadd.f32 1e-06, %v289_v51  ;;  %v263_v53 = vpop.xlane.xlu1 %262 }
 0x18a   :  { %v259_v55 = vpop.xlane.xlu0 %258  ;;  %v292_v56 = vmul.f32 0.0078125, %v263_v53 }
 0x18b   :  { %734 = vrsqrt.f32 %v305_v52  ;;  %v290_v57 = vmul.f32 0.0078125, %v259_v55 }
 0x18c   :  { %736 = vrsqrt.f32 %v307_v54  ;;  %v308_v60 = vadd.f32 1e-06, %v292_v56 }
 0x18d   :  { %v306_v58 = vadd.f32 1e-06, %v290_v57 }
 0x18e   :  { %v269_v59 = vpop.xlane.xlu0 %268 }
 0x18f   :  { %738 = vrsqrt.f32 %v306_v58  ;;  %v295_v5 = vmul.f32 0.0078125, %v269_v59 }
 0x190   :  { %v267_v61 = vpop.xlane.xlu1 %266  ;;  %740 = vrsqrt.f32 %v308_v60 }
 0x191   :  { %v294_v63 = vmul.f32 0.0078125, %v267_v61  ;;  %v311_v12 = vadd.f32 1e-06, %v295_v5 }
 0x192   :  { %v265_v62 = vpop.xlane.xlu0 %264 }
 0x193   :  { %v293_v0 = vmul.f32 0.0078125, %v265_v62  ;;  %v310_v6 = vadd.f32 1e-06, %v294_v63 }
 0x194   :  { %v271_v8 = vpop.xlane.xlu1 %270 }
 0x195   :  { %v735_v1 = vpop.eup %734  ;;  %v309_v2 = vadd.f32 1e-06, %v293_v0  ;;  %v296_v13 = vmul.f32 0.0078125, %v271_v8 }
 0x196   :  { %v337_v4 = vmul.f32 %v735_v1, %v839_v18  ;;  %v737_v7 = vpop.eup %736  ;;  %v273_v14 = vpop.xlane.xlu0 %272 }
 0x197   :  { %742 = vrsqrt.f32 %v309_v2  ;;  %v339_v19 = vmul.f32 %v737_v7, %v835_v16  ;;  %v312_v22 = vadd.f32 1e-06, %v296_v13  ;;  %v297_v26 = vmul.f32 0.0078125, %v273_v14 }
 0x198   :  { %v360_v9 = vmul.f32 %v902_v3, %v337_v4  ;;  %744 = vrsqrt.f32 %v310_v6  ;;  %v275_v27 = vpop.xlane.xlu1 %274 }
 0x199   :  { %v739_v10 = vpop.eup %738  ;;  %746 = vrsqrt.f32 %v311_v12  ;;  %v362_v31 = vmul.f32 %v902_v3, %v339_v19  ;;  %v298_v39 = vmul.f32 0.0078125, %v275_v27 }
 0x19a   :  { %376 = vxpose.xlu0.b32.start [1/16] %v360_v9, 128  ;;  %v338_v11 = vmul.f32 %v739_v10, %v851_v24  ;;  %v741_v18 = vpop.eup %740  ;;  %748 = vrsqrt.f32 %v312_v22  ;;  %v313_v24 = vadd.f32 1e-06, %v297_v26  ;;  %v277_v40 = vpop.xlane.xlu0 %276 }
 0x19b   :  { %v340_v37 = vmul.f32 %v741_v18, %v845_v21  ;;  %v917_v43 = vadd.f32 1e-06, %v298_v39  ;;  %v919_v44 = vmul.f32 0.0078125, %v277_v40  ;;  %v766_v21 = vmov 0  }
 0x19c   :  { %v361_v15 = vmul.f32 %v902_v3, %v338_v11  ;;  %750 = vrsqrt.f32 %v313_v24  ;;  %418 = vst [vmem:[%s1431_s3 + $0x10] sm:$0xff] %v766_v21  ;;  %419 = vst [vmem:[%s1431_s3 + $0x18] sm:$0xff] %v766_v21 }
 0x19d   :  { %v363_v41 = vmul.f32 %v902_v3, %v340_v37  ;;  %420 = vst [vmem:[%s1431_s3 + $0x20] sm:$0xff] %v766_v21  ;;  %421 = vst [vmem:[%s1431_s3 + $0x28] sm:$0xff] %v766_v21  ;;  %752 = vrsqrt.f32 %v917_v43  ;;  %v315_v48 = vadd.f32 1e-06, %v919_v44 }
 0x19e   :  { %377 = vxpose.xlu0.b32.cont [2/16] %v361_v15, 128  ;;  %422 = vst [vmem:[%s1431_s3 + $0x30] sm:$0xff] %v766_v21  ;;  %423 = vst [vmem:[%s1431_s3 + $0x38] sm:$0xff] %v766_v21  ;;  %v281_v50 = vpop.xlane.xlu0 %280 }
 0x19f   :  { %426 = vst [vmem:[%s1431_s3 + $0x50] sm:$0xff] %v766_v21  ;;  %427 = vst [vmem:[%s1431_s3 + $0x58] sm:$0xff] %v766_v21  ;;  %754 = vrsqrt.f32 %v315_v48  ;;  %v301_v55 = vmul.f32 0.0078125, %v281_v50 }
 0x1a0   :  { %428 = vst [vmem:[%s1431_s3 + $0x60] sm:$0xff] %v766_v21  ;;  %429 = vst [vmem:[%s1431_s3 + $0x68] sm:$0xff] %v766_v21 }
 0x1a1   :  { %v743_v38 = vpop.eup %742  ;;  %430 = vst [vmem:[%s1431_s3 + $0x70] sm:$0xff] %v766_v21  ;;  %431 = vst [vmem:[%s1431_s3 + $0x78] sm:$0xff] %v766_v21  ;;  %v317_v59 = vadd.f32 1e-06, %v301_v55 }
 0x1a2   :  { %378 = vxpose.xlu0.b32.cont [3/16] %v362_v31, 128  ;;  %v913_v16 = vmul.f32 %v743_v38, %v863_v30  ;;  %v915_v42 = vpop.eup %744  ;;  %434 = vst [vmem:[%s1431_s3 + $0x90] sm:$0xff] %v766_v21  ;;  %435 = vst [vmem:[%s1431_s3 + $0x98] sm:$0xff] %v766_v21  ;;  %v279_v30 = vpop.xlane.xlu1 %278 }
 0x1a3   :  { %436 = vst [vmem:[%s1431_s3 + $0xa0] sm:$0xff] %v766_v21  ;;  %437 = vst [vmem:[%s1431_s3 + $0xa8] sm:$0xff] %v766_v21  ;;  %v342_v46 = vmul.f32 %v915_v42, %v873_v35  ;;  %v747_v47 = vpop.eup %746  ;;  %v300_v49 = vmul.f32 0.0078125, %v279_v30  ;;  %v285_v61 = vpop.xlane.xlu0 %284 }
 0x1a4   :  { %438 = vst [vmem:[%s1431_s3 + $0xb0] sm:$0xff] %v766_v21  ;;  %439 = vst [vmem:[%s1431_s3 + $0xb8] sm:$0xff] %v766_v21  ;;  %v364_v45 = vmul.f32 %v902_v3, %v913_v16  ;;  %v343_v52 = vmul.f32 %v747_v47, %v859_v28  ;;  %v749_v53 = vpop.eup %748  ;;  %v303_v1 = vmul.f32 0.0078125, %v285_v61 }
 0x1a5   :  { %442 = vst [vmem:[%s1431_s3 + $0xd0] sm:$0xff] %v766_v21  ;;  %443 = vst [vmem:[%s1431_s3 + $0xd8] sm:$0xff] %v766_v21  ;;  %v365_v51 = vmul.f32 %v902_v3, %v342_v46  ;;  %v316_v54 = vadd.f32 1e-06, %v300_v49  ;;  %v344_v57 = vmul.f32 %v749_v53, %v869_v33 }
 0x1a6   :  { %379 = vxpose.xlu0.b32.cont [4/16] %v363_v41, 128  ;;  %444 = vst [vmem:[%s1431_s3 + $0xe0] sm:$0xff] %v766_v21  ;;  %445 = vst [vmem:[%s1431_s3 + $0xe8] sm:$0xff] %v766_v21  ;;  %v283_v56 = vpop.xlane.xlu1 %282  ;;  %v366_v35 = vmul.f32 %v902_v3, %v343_v52  ;;  %v751_v58 = vpop.eup %750  ;;  %v319_v6 = vadd.f32 1e-06, %v303_v1 }
 0x1a7   :  { %446 = vst [vmem:[%s1431_s3 + $0xf0] sm:$0xff] %v766_v21  ;;  %447 = vst [vmem:[%s1431_s3 + $0xf8] sm:$0xff] %v766_v21  ;;  %756 = vrsqrt.f32 %v316_v54  ;;  %v302_v60 = vmul.f32 0.0078125, %v283_v56  ;;  %v367_v62 = vmul.f32 %v902_v3, %v344_v57  ;;  %v345_v28 = vmul.f32 %v751_v58, %v843_v20  ;;  %v753_v63 = vpop.eup %752 }
 0x1a8   :  { %448 = vst [vmem:[%s1431_s3 + $0x100] sm:$0xff] %v766_v21  ;;  %449 = vst [vmem:[%s1431_s3 + $0x108] sm:$0xff] %v766_v21  ;;  %758 = vrsqrt.f32 %v317_v59  ;;  %v346_v33 = vmul.f32 %v753_v63, %v853_v25 }
 0x1a9   :  { %452 = vst [vmem:[%s1431_s3 + $0x120] sm:$0xff] %v766_v21  ;;  %453 = vst [vmem:[%s1431_s3 + $0x128] sm:$0xff] %v766_v21  ;;  %v318_v0 = vadd.f32 1e-06, %v302_v60  ;;  %v368_v4 = vmul.f32 %v902_v3, %v345_v28  ;;  %v755_v5 = vpop.eup %754 }
 0x1aa   :  { %454 = vst [vmem:[%s1431_s3 + $0x130] sm:$0xff] %v766_v21  ;;  %455 = vst [vmem:[%s1431_s3 + $0x138] sm:$0xff] %v766_v21  ;;  %380 = vxpose.xlu0.b32.cont [5/16] %v364_v45, 128  ;;  %v287_v2 = vpop.xlane.xlu1 %286  ;;  %v369_v8 = vmul.f32 %v902_v3, %v346_v33  ;;  %v347_v9 = vmul.f32 %v755_v5, %v837_v17 }
 0x1ab   :  { %456 = vst [vmem:[%s1431_s3 + $0x140] sm:$0xff] %v766_v21  ;;  %457 = vst [vmem:[%s1431_s3 + $0x148] sm:$0xff] %v766_v21  ;;  %760 = vrsqrt.f32 %v318_v0  ;;  %v304_v7 = vmul.f32 0.0078125, %v287_v2 }
 0x1ac   :  { %460 = vst [vmem:[%s1431_s3 + $0x160] sm:$0xff] %v766_v21  ;;  %461 = vst [vmem:[%s1431_s3 + $0x168] sm:$0xff] %v766_v21  ;;  %762 = vrsqrt.f32 %v319_v6  ;;  %v370_v11 = vmul.f32 %v902_v3, %v347_v9 }
 0x1ad   :  { %462 = vst [vmem:[%s1431_s3 + $0x170] sm:$0xff] %v766_v21  ;;  %463 = vst [vmem:[%s1431_s3 + $0x178] sm:$0xff] %v766_v21  ;;  %v320_v10 = vadd.f32 1e-06, %v304_v7 }
 0x1ae   :  { %464 = vst [vmem:[%s1431_s3 + $0x180] sm:$0xff] %v766_v21  ;;  %465 = vst [vmem:[%s1431_s3 + $0x188] sm:$0xff] %v766_v21  ;;  %381 = vxpose.xlu0.b32.cont [6/16] %v365_v51, 128 }
 0x1af   :  { %468 = vst [vmem:[%s1431_s3 + $0x1a0] sm:$0xff] %v766_v21  ;;  %469 = vst [vmem:[%s1431_s3 + $0x1a8] sm:$0xff] %v766_v21  ;;  %764 = vrsqrt.f32 %v320_v10 }
 0x1b0   :  { %470 = vst [vmem:[%s1431_s3 + $0x1b0] sm:$0xff] %v766_v21  ;;  %471 = vst [vmem:[%s1431_s3 + $0x1b8] sm:$0xff] %v766_v21 }
 0x1b1   :  { %472 = vst [vmem:[%s1431_s3 + $0x1c0] sm:$0xff] %v766_v21  ;;  %473 = vst [vmem:[%s1431_s3 + $0x1c8] sm:$0xff] %v766_v21  ;;  %v757_v20 = vpop.eup %756 }
 0x1b2   :  { %476 = vst [vmem:[%s1431_s3 + $0x1e0] sm:$0xff] %v766_v21  ;;  %477 = vst [vmem:[%s1431_s3 + $0x1e8] sm:$0xff] %v766_v21  ;;  %382 = vxpose.xlu0.b32.cont [7/16] %v366_v35, 128  ;;  %v348_v12 = vmul.f32 %v757_v20, %v849_v23  ;;  %v759_v13 = vpop.eup %758 }
 0x1b3   :  { %478 = vst [vmem:[%s1431_s3 + $0x1f0] sm:$0xff] %v766_v21  ;;  %479 = vst [vmem:[%s1431_s3 + $0x1f8] sm:$0xff] %v766_v21  ;;  %v349_v14 = vmul.f32 %v759_v13, %v867_v32 }
 0x1b4   :  { %480 = vst [vmem:[%s1431_s3 + $0x200] sm:$0xff] %v766_v21  ;;  %481 = vst [vmem:[%s1431_s3 + $0x208] sm:$0xff] %v766_v21  ;;  %v371_v25 = vmul.f32 %v902_v3, %v348_v12 }
 0x1b5   :  { %482 = vst [vmem:[%s1431_s3 + $0x210] sm:$0xff] %v766_v21  ;;  %483 = vst [vmem:[%s1431_s3 + $0x218] sm:$0xff] %v766_v21  ;;  %v761_v15 = vpop.eup %760  ;;  %v372_v19 = vmul.f32 %v902_v3, %v349_v14 }
 0x1b6   :  { %486 = vst [vmem:[%s1431_s3 + $0x230] sm:$0xff] %v766_v21  ;;  %487 = vst [vmem:[%s1431_s3 + $0x238] sm:$0xff] %v766_v21  ;;  %383 = vxpose.xlu0.b32.cont [8/16] %v367_v62, 128  ;;  %v350_v17 = vmul.f32 %v761_v15, %v875_v36  ;;  %v763_v18 = vpop.eup %762 }
 0x1b7   :  { %488 = vst [vmem:[%s1431_s3 + $0x240] sm:$0xff] %v766_v21  ;;  %489 = vst [vmem:[%s1431_s3 + $0x248] sm:$0xff] %v766_v21  ;;  %v351_v26 = vmul.f32 %v763_v18, %v861_v29 }
 0x1b8   :  { %490 = vst [vmem:[%s1431_s3 + $0x250] sm:$0xff] %v766_v21  ;;  %491 = vst [vmem:[%s1431_s3 + $0x258] sm:$0xff] %v766_v21  ;;  %v373_v22 = vmul.f32 %v902_v3, %v350_v17 }
 0x1b9   :  { %494 = vst [vmem:[%s1431_s3 + $0x270] sm:$0xff] %v766_v21  ;;  %495 = vst [vmem:[%s1431_s3 + $0x278] sm:$0xff] %v766_v21  ;;  %v765_v23 = vpop.eup %764  ;;  %v374_v27 = vmul.f32 %v902_v3, %v351_v26 }
 0x1ba   :  { %496 = vst [vmem:[%s1431_s3 + $0x280] sm:$0xff] %v766_v21  ;;  %497 = vst [vmem:[%s1431_s3 + $0x288] sm:$0xff] %v766_v21  ;;  %384 = vxpose.xlu0.b32.cont [9/16] %v368_v4, 128  ;;  %v352_v31 = vmul.f32 %v765_v23, %v871_v34 }
 0x1bb   :  { %498 = vst [vmem:[%s1431_s3 + $0x290] sm:$0xff] %v766_v21  ;;  %499 = vst [vmem:[%s1431_s3 + $0x298] sm:$0xff] %v766_v21 }
 0x1bc   :  { %502 = vst [vmem:[%s1431_s3 + $0x2b0] sm:$0xff] %v766_v21  ;;  %503 = vst [vmem:[%s1431_s3 + $0x2b8] sm:$0xff] %v766_v21  ;;  %v375_v32 = vmul.f32 %v902_v3, %v352_v31 }
 0x1bd   :  { %504 = vst [vmem:[%s1431_s3 + $0x2c0] sm:$0xff] %v766_v21  ;;  %505 = vst [vmem:[%s1431_s3 + $0x2c8] sm:$0xff] %v766_v21 }
 0x1be   :  { %506 = vst [vmem:[%s1431_s3 + $0x2d0] sm:$0xff] %v766_v21  ;;  %507 = vst [vmem:[%s1431_s3 + $0x2d8] sm:$0xff] %v766_v21  ;;  %385 = vxpose.xlu0.b32.cont [10/16] %v369_v8, 128 }
 0x1bf   :  { %510 = vst [vmem:[%s1431_s3 + $0x2f0] sm:$0xff] %v766_v21  ;;  %511 = vst [vmem:[%s1431_s3 + $0x2f8] sm:$0xff] %v766_v21 }
 0x1c0   :  { %512 = vst [vmem:[%s1431_s3 + $0x300] sm:$0xff] %v766_v21  ;;  %513 = vst [vmem:[%s1431_s3 + $0x308] sm:$0xff] %v766_v21 }
 0x1c1   :  { %514 = vst [vmem:[%s1431_s3 + $0x310] sm:$0xff] %v766_v21  ;;  %515 = vst [vmem:[%s1431_s3 + $0x318] sm:$0xff] %v766_v21 }
 0x1c2   :  { %516 = vst [vmem:[%s1431_s3 + $0x320] sm:$0xff] %v766_v21  ;;  %517 = vst [vmem:[%s1431_s3 + $0x328] sm:$0xff] %v766_v21  ;;  %386 = vxpose.xlu0.b32.cont [11/16] %v370_v11, 128 }
 0x1c3   :  { %520 = vst [vmem:[%s1431_s3 + $0x340] sm:$0xff] %v766_v21  ;;  %521 = vst [vmem:[%s1431_s3 + $0x348] sm:$0xff] %v766_v21 }
 0x1c4   :  { %522 = vst [vmem:[%s1431_s3 + $0x350] sm:$0xff] %v766_v21  ;;  %523 = vst [vmem:[%s1431_s3 + $0x358] sm:$0xff] %v766_v21 }
 0x1c5   :  { %524 = vst [vmem:[%s1431_s3 + $0x360] sm:$0xff] %v766_v21  ;;  %525 = vst [vmem:[%s1431_s3 + $0x368] sm:$0xff] %v766_v21 }
 0x1c6   :  { %528 = vst [vmem:[%s1431_s3 + $0x380] sm:$0xff] %v766_v21  ;;  %529 = vst [vmem:[%s1431_s3 + $0x388] sm:$0xff] %v766_v21  ;;  %387 = vxpose.xlu0.b32.cont [12/16] %v371_v25, 128 }
 0x1c7   :  { %530 = vst [vmem:[%s1431_s3 + $0x390] sm:$0xff] %v766_v21  ;;  %531 = vst [vmem:[%s1431_s3 + $0x398] sm:$0xff] %v766_v21 }
 0x1c8   :  { %532 = vst [vmem:[%s1431_s3 + $0x3a0] sm:$0xff] %v766_v21  ;;  %533 = vst [vmem:[%s1431_s3 + $0x3a8] sm:$0xff] %v766_v21 }
 0x1c9   :  { %536 = vst [vmem:[%s1431_s3 + $0x3c0] sm:$0xff] %v766_v21  ;;  %537 = vst [vmem:[%s1431_s3 + $0x3c8] sm:$0xff] %v766_v21 }
 0x1ca   :  { %538 = vst [vmem:[%s1431_s3 + $0x3d0] sm:$0xff] %v766_v21  ;;  %539 = vst [vmem:[%s1431_s3 + $0x3d8] sm:$0xff] %v766_v21  ;;  %388 = vxpose.xlu0.b32.cont [13/16] %v372_v19, 128 }
 0x1cb   :  { %540 = vst [vmem:[%s1431_s3 + $0x3e0] sm:$0xff] %v766_v21  ;;  %541 = vst [vmem:[%s1431_s3 + $0x3e8] sm:$0xff] %v766_v21 }
 0x1ce   :  { %389 = vxpose.xlu0.b32.cont [14/16] %v373_v22, 128 }
 0x1d2   :  { %390 = vxpose.xlu0.b32.cont [15/16] %v374_v27, 128 }
 0x1d6   :  { %391 = vxpose.xlu0.b32.end [16/16] %v375_v32, 128 }
 0x21a   :  { %v392_v37 = vpop.trf.xlu0 }
 0x21e   :  { %v393_v38 = vpop.trf.xlu0 }
 0x222   :  { %v394_v24 = vpop.trf.xlu0 }
 0x226   :  { %v395_v36 = vpop.trf.xlu0 }
 0x22a   :  { %v396_v39 = vpop.trf.xlu0 }
 0x22b   :  { %v645_v40 = vpack.c.bf16 %v396_v39, %v392_v37 }
 0x22d   :  { %584 = vst [vmem:[%s1431_s3] sm:$0xff] %v645_v40  ;;  %592 = vst [vmem:[%s1431_s3 + $0x110] sm:$0xff] %v645_v40 }
 0x22e   :  { %600 = vst [vmem:[%s1431_s3 + $0x220] sm:$0xff] %v645_v40  ;;  %608 = vst [vmem:[%s1431_s3 + $0x330] sm:$0xff] %v645_v40  ;;  %v397_v29 = vpop.trf.xlu0 }
 0x22f   :  { %v647_v34 = vpack.c.bf16 %v397_v29, %v393_v38 }
 0x231   :  { %586 = vst [vmem:[%s1431_s3 + $0x40] sm:$0xff] %v647_v34  ;;  %594 = vst [vmem:[%s1431_s3 + $0x150] sm:$0xff] %v647_v34 }
 0x232   :  { %602 = vst [vmem:[%s1431_s3 + $0x260] sm:$0xff] %v647_v34  ;;  %610 = vst [vmem:[%s1431_s3 + $0x370] sm:$0xff] %v647_v34  ;;  %v398_v3 = vpop.trf.xlu0 }
 0x233   :  { %v649_v41 = vpack.c.bf16 %v398_v3, %v394_v24 }
 0x235   :  { %588 = vst [vmem:[%s1431_s3 + $0x80] sm:$0xff] %v649_v41  ;;  %596 = vst [vmem:[%s1431_s3 + $0x190] sm:$0xff] %v649_v41 }
 0x236   :  { %604 = vst [vmem:[%s1431_s3 + $0x2a0] sm:$0xff] %v649_v41  ;;  %612 = vst [vmem:[%s1431_s3 + $0x3b0] sm:$0xff] %v649_v41  ;;  %v399_v16 = vpop.trf.xlu0 }
 0x237   :  { %v651_v42 = vpack.c.bf16 %v399_v16, %v395_v36 }
 0x239   :  { %590 = vst [vmem:[%s1431_s3 + $0xc0] sm:$0xff] %v651_v42  ;;  %598 = vst [vmem:[%s1431_s3 + $0x1d0] sm:$0xff] %v651_v42 }
 0x23a   :  { %606 = vst [vmem:[%s1431_s3 + $0x2e0] sm:$0xff] %v651_v42  ;;  %614 = vst [vmem:[%s1431_s3 + $0x3f0] sm:$0xff] %v651_v42  ;;  %v400_v43 = vpop.trf.xlu0 }
 0x23e   :  { %v401_v44 = vpop.trf.xlu0 }
 0x242   :  { %v402_v21 = vpop.trf.xlu0 }
 0x246   :  { %v403_v30 = vpop.trf.xlu0 }
 0x24a   :  { %v404_v45 = vpop.trf.xlu0 }
 0x24b   :  { %v646_v46 = vpack.c.bf16 %v404_v45, %v400_v43 }
 0x24d   :  { %585 = vst [vmem:[%s1431_s3 + $0x8] sm:$0xff] %v646_v46  ;;  %593 = vst [vmem:[%s1431_s3 + $0x118] sm:$0xff] %v646_v46 }
 0x24e   :  { %601 = vst [vmem:[%s1431_s3 + $0x228] sm:$0xff] %v646_v46  ;;  %609 = vst [vmem:[%s1431_s3 + $0x338] sm:$0xff] %v646_v46  ;;  %v405_v47 = vpop.trf.xlu0 }
 0x24f   :  { %v648_v48 = vpack.c.bf16 %v405_v47, %v401_v44 }
 0x251   :  { %587 = vst [vmem:[%s1431_s3 + $0x48] sm:$0xff] %v648_v48  ;;  %595 = vst [vmem:[%s1431_s3 + $0x158] sm:$0xff] %v648_v48 }
 0x252   :  { %603 = vst [vmem:[%s1431_s3 + $0x268] sm:$0xff] %v648_v48  ;;  %611 = vst [vmem:[%s1431_s3 + $0x378] sm:$0xff] %v648_v48  ;;  %v406_v49 = vpop.trf.xlu0 }
 0x253   :  { %v650_v50 = vpack.c.bf16 %v406_v49, %v402_v21 }
 0x255   :  { %589 = vst [vmem:[%s1431_s3 + $0x88] sm:$0xff] %v650_v50  ;;  %597 = vst [vmem:[%s1431_s3 + $0x198] sm:$0xff] %v650_v50 }
 0x256   :  { %605 = vst [vmem:[%s1431_s3 + $0x2a8] sm:$0xff] %v650_v50  ;;  %613 = vst [vmem:[%s1431_s3 + $0x3b8] sm:$0xff] %v650_v50  ;;  %v407_v51 = vpop.trf.xlu0 }
 0x257   :  { %v652_v52 = vpack.c.bf16 %v407_v51, %v403_v30 }
 0x259   :  { %591 = vst [vmem:[%s1431_s3 + $0xc8] sm:$0xff] %v652_v52  ;;  %599 = vst [vmem:[%s1431_s3 + $0x1d8] sm:$0xff] %v652_v52 }
 0x25a   :  { %607 = vst [vmem:[%s1431_s3 + $0x2e8] sm:$0xff] %v652_v52  ;;  %615 = vst [vmem:[%s1431_s3 + $0x3f8] sm:$0xff] %v652_v52 }

// kernel: cross_attention_forward.3
= control target key start
LH: loop header
LB: loop body
LE: loop exit
PB: predicated region body
PF: predicated region fallthrough
CT: control target
= control target key end

     0   :  { %v1567_v0 = vmov 0.0   ;;  %vm1568_vm0 = vmmov 0   ;;  %s2080_s1 = inlined_call_operand.vmem [shape: bf16[128,128], index: 1, kind: input, shape index: {}]   ;;  %s2081_s0 = inlined_call_operand.vmem [shape: bf16[8,128], index: 0, kind: input, shape index: {}]   ;;  %s2082_s3 = inlined_call_operand.vmem [shape: bf16[128,2048], index: 3, kind: input, shape index: {}]   ;;  %s2083_s2 = inlined_call_operand.vmem [shape: f32[1,128], index: 2, kind: input, shape index: {}]   ;;  %s2084_s4 = inlined_call_operand.vmem [shape: f32[8,2048], index: 4, kind: output, shape index: {}]  }
   0x1   :  { %1494 = vmatprep.subr.bf16.mxu0 %v1567_v0  ;;  %v1517_v1 = vld [vmem:[%s2080_s1] sm:$0xff]   ;;  %1510 = vmatprep.mubr.msk.bf16.mxu0 %vm1568_vm0, %v1567_v0  ;;  %v1518_v2 = vld [vmem:[%s2080_s1 + $0x8] sm:$0xff]   ;;  %v1519_v3 = vld [vmem:[%s2080_s1 + $0x10] sm:$0xff]  }
   0x2   :  { %1495 = vmatpush3.bf16.msra.mxu0 %v1517_v1  ;;  %v1520_v4 = vld [vmem:[%s2080_s1 + $0x18] sm:$0xff]   ;;  %v1521_v5 = vld [vmem:[%s2080_s1 + $0x20] sm:$0xff]   ;;  %v1522_v6 = vld [vmem:[%s2080_s1 + $0x28] sm:$0xff]  }
   0x3   :  { %1496 = vmatprep.subr.bf16.mxu0 %v1567_v0  ;;  %v1523_v7 = vld [vmem:[%s2080_s1 + $0x30] sm:$0xff]   ;;  %v1524_v8 = vld [vmem:[%s2080_s1 + $0x38] sm:$0xff]   ;;  %v18_v9 = vld [vmem:[%s2081_s0] sm:$0xf] }
   0x4   :  { %v140_v10 = vld [vmem:[%s2082_s3] sm:$0xff]  ;;  %v141_v12 = vld [vmem:[%s2082_s3 + $0x8] sm:$0xff] }
   0x5   :  { %v148_v11 = vld [vmem:[%s2082_s3 + $0x40] sm:$0xff]  ;;  %v149_v14 = vld [vmem:[%s2082_s3 + $0x48] sm:$0xff] }
   0x6   :  { %1497 = vmatpush3.bf16.msra.mxu0 %v1518_v2  ;;  %v1358_v13 = vcombine.high %v140_v10, %v148_v11  ;;  %v1357_v15 = vcombine.low %v140_v10, %v148_v11  ;;  %v156_v16 = vld [vmem:[%s2082_s3 + $0x80] sm:$0xff]  ;;  %v1359_v18 = vcombine.low %v141_v12, %v149_v14  ;;  %v1360_v19 = vcombine.high %v141_v12, %v149_v14  ;;  %v157_v21 = vld [vmem:[%s2082_s3 + $0x88] sm:$0xff] }
   0x7   :  { %1498 = vmatprep.subr.bf16.mxu0 %v1567_v0  ;;  %v164_v17 = vld [vmem:[%s2082_s3 + $0xc0] sm:$0xff]  ;;  %v165_v22 = vld [vmem:[%s2082_s3 + $0xc8] sm:$0xff] }
   0x8   :  { %v1374_v20 = vcombine.high %v156_v16, %v164_v17  ;;  %v172_v23 = vld [vmem:[%s2082_s3 + $0x100] sm:$0xff]  ;;  %908 = vmatprep.subr.bf16.mxu1 %v1358_v13  ;;  %v1376_v24 = vcombine.high %v157_v21, %v165_v22  ;;  %v173_v26 = vld [vmem:[%s2082_s3 + $0x108] sm:$0xff]  ;;  %v1373_v28 = vcombine.low %v156_v16, %v164_v17  ;;  %v1375_v29 = vcombine.low %v157_v21, %v165_v22  ;;  %v150_v16 = vld [vmem:[%s2082_s3 + $0x50] sm:$0xff] }
   0x9   :  { %v180_v25 = vld [vmem:[%s2082_s3 + $0x140] sm:$0xff]  ;;  %v181_v27 = vld [vmem:[%s2082_s3 + $0x148] sm:$0xff]  ;;  %909 = vmatpush1.bf16.msra.mxu1 %v1357_v15  ;;  %v142_v15 = vld [vmem:[%s2082_s3 + $0x10] sm:$0xff] }
   0xa   :  { %1499 = vmatpush3.bf16.msra.mxu0 %v1519_v3  ;;  %910 = vmatprep.subr.bf16.mxu1 %v1374_v20  ;;  %v1390_v30 = vcombine.high %v172_v23, %v180_v25  ;;  %v1392_v31 = vcombine.high %v173_v26, %v181_v27  ;;  %v1389_v32 = vcombine.low %v172_v23, %v180_v25  ;;  %v188_v39 = vld [vmem:[%s2082_s3 + $0x180] sm:$0xff]  ;;  %v189_v41 = vld [vmem:[%s2082_s3 + $0x188] sm:$0xff]  ;;  %v143_v17 = vld [vmem:[%s2082_s3 + $0x18] sm:$0xff]  ;;  %v1569_v23 = vmov 0  }
   0xb   :  { %1500 = vmatprep.subr.bf16.mxu0 %v1567_v0  ;;  %v1391_v33 = vcombine.low %v173_v26, %v181_v27  ;;  %v196_v40 = vld [vmem:[%s2082_s3 + $0x1c0] sm:$0xff]  ;;  %v197_v43 = vld [vmem:[%s2082_s3 + $0x1c8] sm:$0xff]  ;;  %v1361_v20 = vcombine.low %v142_v15, %v150_v16  ;;  %940 = vmatprep.mubr.bf16.mxu1 %v1569_v23 }
   0xc   :  { %v1406_v42 = vcombine.high %v188_v39, %v196_v40  ;;  %v1407_v44 = vcombine.low %v189_v41, %v197_v43  ;;  %v1408_v45 = vcombine.high %v189_v41, %v197_v43  ;;  %v1405_v46 = vcombine.low %v188_v39, %v196_v40  ;;  %v204_v47 = vld [vmem:[%s2082_s3 + $0x200] sm:$0xff]  ;;  %v205_v49 = vld [vmem:[%s2082_s3 + $0x208] sm:$0xff]  ;;  %v182_v39 = vld [vmem:[%s2082_s3 + $0x150] sm:$0xff] }
   0xd   :  { %911 = vmatpush1.bf16.msra.mxu1 %v1373_v28  ;;  %v212_v48 = vld [vmem:[%s2082_s3 + $0x240] sm:$0xff]  ;;  %v213_v51 = vld [vmem:[%s2082_s3 + $0x248] sm:$0xff]  ;;  %v175_v40 = vld [vmem:[%s2082_s3 + $0x118] sm:$0xff] }
   0xe   :  { %1501 = vmatpush3.bf16.msra.mxu0 %v1520_v4  ;;  %912 = vmatprep.subr.bf16.mxu1 %v1390_v30  ;;  %v1422_v50 = vcombine.high %v204_v47, %v212_v48  ;;  %v1423_v52 = vcombine.low %v205_v49, %v213_v51  ;;  %v1424_v53 = vcombine.high %v205_v49, %v213_v51  ;;  %v220_v55 = vld [vmem:[%s2082_s3 + $0x280] sm:$0xff]  ;;  %v221_v57 = vld [vmem:[%s2082_s3 + $0x288] sm:$0xff]  ;;  %v158_v30 = vld [vmem:[%s2082_s3 + $0x90] sm:$0xff] }
   0xf   :  { %1502 = vmatprep.subr.bf16.mxu0 %v1567_v0  ;;  %v1421_v54 = vcombine.low %v204_v47, %v212_v48  ;;  %v228_v56 = vld [vmem:[%s2082_s3 + $0x2c0] sm:$0xff]  ;;  %v229_v59 = vld [vmem:[%s2082_s3 + $0x2c8] sm:$0xff]  ;;  %v183_v41 = vld [vmem:[%s2082_s3 + $0x158] sm:$0xff] }
  0x10   :  { %v1438_v58 = vcombine.high %v220_v55, %v228_v56  ;;  %v1439_v60 = vcombine.low %v221_v57, %v229_v59  ;;  %v1440_v61 = vcombine.high %v221_v57, %v229_v59  ;;  %v1437_v62 = vcombine.low %v220_v55, %v228_v56  ;;  %v236_v63 = vld [vmem:[%s2082_s3 + $0x300] sm:$0xff]  ;;  %v237_v1 = vld [vmem:[%s2082_s3 + $0x308] sm:$0xff]  ;;  %v198_v47 = vld [vmem:[%s2082_s3 + $0x1d0] sm:$0xff] }
  0x11   :  { %913 = vmatpush1.bf16.msra.mxu1 %v1389_v32  ;;  %v245_v3 = vld [vmem:[%s2082_s3 + $0x348] sm:$0xff]  ;;  %v1356_v28 = vld [vmem:[%s2083_s2] ss:$0 sm:$0xff]  ;;  %v159_v32 = vld [vmem:[%s2082_s3 + $0x98] sm:$0xff]  ;;  %v1395_v51 = vcombine.low %v175_v40, %v183_v41 }
  0x12   :  { %1503 = vmatpush3.bf16.msra.mxu0 %v1521_v5  ;;  %914 = vmatprep.subr.bf16.mxu1 %v1406_v42  ;;  %v1455_v4 = vcombine.low %v237_v1, %v245_v3  ;;  %v1456_v5 = vcombine.high %v237_v1, %v245_v3  ;;  %v261_v11 = vld [vmem:[%s2082_s3 + $0x3c8] sm:$0xff]  ;;  %v191_v48 = vld [vmem:[%s2082_s3 + $0x198] sm:$0xff]  ;;  %v214_v55 = vld [vmem:[%s2082_s3 + $0x250] sm:$0xff] }
  0x13   :  { %1504 = vmatprep.subr.bf16.mxu0 %v1567_v0  ;;  %v199_v49 = vld [vmem:[%s2082_s3 + $0x1d8] sm:$0xff] }
  0x14   :  { %v207_v56 = vld [vmem:[%s2082_s3 + $0x218] sm:$0xff]  ;;  %v1411_v59 = vcombine.low %v191_v48, %v199_v49 }
  0x15   :  { %915 = vmatpush1.bf16.msra.mxu1 %v1405_v46  ;;  %v190_v46 = vld [vmem:[%s2082_s3 + $0x190] sm:$0xff]  ;;  %v215_v57 = vld [vmem:[%s2082_s3 + $0x258] sm:$0xff] }
  0x16   :  { %1505 = vmatpush3.bf16.msra.mxu0 %v1522_v6  ;;  %916 = vmatprep.subr.bf16.mxu1 %v1422_v50  ;;  %v231_v1 = vld [vmem:[%s2082_s3 + $0x2d8] sm:$0xff]  ;;  %v1427_v3 = vcombine.low %v207_v56, %v215_v57 }
  0x17   :  { %1506 = vmatprep.subr.bf16.mxu0 %v1567_v0 }
  0x19   :  { %917 = vmatpush1.bf16.msra.mxu1 %v1421_v54  ;;  %v206_v54 = vld [vmem:[%s2082_s3 + $0x210] sm:$0xff] }
  0x1a   :  { %1507 = vmatpush3.bf16.msra.mxu0 %v1523_v7  ;;  %918 = vmatprep.subr.bf16.mxu1 %v1438_v58  ;;  %v252_v7 = vld [vmem:[%s2082_s3 + $0x380] sm:$0xff]  ;;  %v1409_v58 = vcombine.low %v190_v46, %v198_v47 }
  0x1b   :  { %1508 = vmatprep.subr.bf16.mxu0 %v1567_v0  ;;  %v244_v0 = vld [vmem:[%s2082_s3 + $0x340] sm:$0xff] }
  0x1c   :  { %v1454_v2 = vcombine.high %v236_v63, %v244_v0  ;;  %v1453_v6 = vcombine.low %v236_v63, %v244_v0  ;;  %v230_v63 = vld [vmem:[%s2082_s3 + $0x2d0] sm:$0xff]  ;;  %v223_v0 = vld [vmem:[%s2082_s3 + $0x298] sm:$0xff] }
  0x1d   :  { %919 = vmatpush1.bf16.msra.mxu1 %v1437_v62  ;;  %v222_v62 = vld [vmem:[%s2082_s3 + $0x290] sm:$0xff] }
  0x1e   :  { %1509 = vmatpush3.bf16.msra.mxu0 %v1524_v8  ;;  %920 = vmatprep.subr.bf16.mxu1 %v1454_v2  ;;  %v260_v8 = vld [vmem:[%s2082_s3 + $0x3c0] sm:$0xff]  ;;  %v1425_v2 = vcombine.low %v206_v54, %v214_v55 }
  0x1f   :  { %949 = vmatprep.subr.bf16.mxu0 %v1360_v19  ;;  %v1470_v10 = vcombine.high %v252_v7, %v260_v8  ;;  %v1469_v14 = vcombine.low %v252_v7, %v260_v8  ;;  %v151_v19 = vld [vmem:[%s2082_s3 + $0x58] sm:$0xff]  ;;  %v246_v7 = vld [vmem:[%s2082_s3 + $0x350] sm:$0xff] }
  0x20   :  { %v1363_v21 = vcombine.low %v143_v17, %v151_v19  ;;  %v1364_v22 = vcombine.high %v143_v17, %v151_v19  ;;  %v239_v8 = vld [vmem:[%s2082_s3 + $0x318] sm:$0xff] }
  0x21   :  { %1511 = vmatmul.mubr.bf16.vlgmr.msra.gmra.mrb[0].mxu0 %v18_v9  ;;  %921 = vmatpush1.bf16.msra.mxu1 %v1453_v6  ;;  %v253_v9 = vld [vmem:[%s2082_s3 + $0x388] sm:$0xff]  ;;  %v238_v6 = vld [vmem:[%s2082_s3 + $0x310] sm:$0xff]  ;;  %v263_v17 = vld [vmem:[%s2082_s3 + $0x3d8] sm:$0xff] }
  0x22   :  { %950 = vmatpush1.bf16.msra.mxu0 %v1359_v18  ;;  %v1471_v12 = vcombine.low %v253_v9, %v261_v11  ;;  %v1472_v13 = vcombine.high %v253_v9, %v261_v11  ;;  %922 = vmatprep.subr.bf16.mxu1 %v1470_v10  ;;  %v1362_v18 = vcombine.high %v142_v15, %v150_v16  ;;  %v247_v9 = vld [vmem:[%s2082_s3 + $0x358] sm:$0xff]  ;;  %v262_v15 = vld [vmem:[%s2082_s3 + $0x3d0] sm:$0xff] }
  0x23   :  { %951 = vmatprep.subr.bf16.mxu0 %v1376_v24  ;;  %981 = vmatprep.mubr.bf16.mxu0 %v1569_v23  ;;  %v1441_v10 = vcombine.low %v222_v62, %v230_v63  ;;  %v1443_v11 = vcombine.low %v223_v0, %v231_v1  ;;  %v255_v16 = vld [vmem:[%s2082_s3 + $0x398] sm:$0xff]  ;;  %v1459_v19 = vcombine.low %v239_v8, %v247_v9 }
  0x25   :  { %923 = vmatpush1.bf16.msra.mxu1 %v1469_v14  ;;  %v254_v14 = vld [vmem:[%s2082_s3 + $0x390] sm:$0xff] }
  0x26   :  { %952 = vmatpush1.bf16.msra.mxu0 %v1375_v29  ;;  %990 = vmatprep.subr.bf16.mxu1 %v1362_v18  ;;  %v1457_v18 = vcombine.low %v238_v6, %v246_v7 }
  0x27   :  { %953 = vmatprep.subr.bf16.mxu0 %v1392_v31  ;;  %v166_v31 = vld [vmem:[%s2082_s3 + $0xd0] sm:$0xff] }
  0x28   :  { %v1377_v42 = vcombine.low %v158_v30, %v166_v31 }
  0x2a   :  { %954 = vmatpush1.bf16.msra.mxu0 %v1391_v33  ;;  %v167_v33 = vld [vmem:[%s2082_s3 + $0xd8] sm:$0xff] }
  0x2b   :  { %955 = vmatprep.subr.bf16.mxu0 %v1408_v45  ;;  %v1379_v43 = vcombine.low %v159_v32, %v167_v33  ;;  %v1396_v45 = vcombine.high %v175_v40, %v183_v41  ;;  %v176_v40 = vld [vmem:[%s2082_s3 + $0x120] sm:$0xff] }
  0x2c   :  { %v184_v41 = vld [vmem:[%s2082_s3 + $0x160] sm:$0xff] }
  0x2e   :  { %956 = vmatpush1.bf16.msra.mxu0 %v1407_v44 }
  0x2f   :  { %957 = vmatprep.subr.bf16.mxu0 %v1424_v53  ;;  %v1412_v53 = vcombine.high %v191_v48, %v199_v49  ;;  %v192_v48 = vld [vmem:[%s2082_s3 + $0x1a0] sm:$0xff] }
  0x30   :  { %v200_v49 = vld [vmem:[%s2082_s3 + $0x1e0] sm:$0xff] }
  0x32   :  { %958 = vmatpush1.bf16.msra.mxu0 %v1423_v52  ;;  %v1410_v52 = vcombine.high %v190_v46, %v198_v47  ;;  %v1398_v46 = vcombine.high %v176_v40, %v184_v41 }
  0x33   :  { %959 = vmatprep.subr.bf16.mxu0 %v1440_v61  ;;  %v1428_v61 = vcombine.high %v207_v56, %v215_v57  ;;  %v208_v56 = vld [vmem:[%s2082_s3 + $0x220] sm:$0xff] }
  0x34   :  { %v216_v57 = vld [vmem:[%s2082_s3 + $0x260] sm:$0xff] }
  0x36   :  { %960 = vmatpush1.bf16.msra.mxu0 %v1439_v60  ;;  %v1426_v60 = vcombine.high %v206_v54, %v214_v55  ;;  %v1414_v54 = vcombine.high %v192_v48, %v200_v49 }
  0x37   :  { %961 = vmatprep.subr.bf16.mxu0 %v1456_v5  ;;  %v1444_v5 = vcombine.high %v223_v0, %v231_v1  ;;  %v224_v0 = vld [vmem:[%s2082_s3 + $0x2a0] sm:$0xff] }
  0x38   :  { %v232_v1 = vld [vmem:[%s2082_s3 + $0x2e0] sm:$0xff] }
  0x3a   :  { %962 = vmatpush1.bf16.msra.mxu0 %v1455_v4  ;;  %v1442_v4 = vcombine.high %v222_v62, %v230_v63  ;;  %v1430_v62 = vcombine.high %v208_v56, %v216_v57 }
  0x3b   :  { %963 = vmatprep.subr.bf16.mxu0 %v1472_v13  ;;  %v1460_v13 = vcombine.high %v239_v8, %v247_v9  ;;  %v240_v8 = vld [vmem:[%s2082_s3 + $0x320] sm:$0xff] }
  0x3c   :  { %v248_v9 = vld [vmem:[%s2082_s3 + $0x360] sm:$0xff] }
  0x3e   :  { %964 = vmatpush1.bf16.msra.mxu0 %v1471_v12  ;;  %v1458_v12 = vcombine.high %v238_v6, %v246_v7  ;;  %v1446_v6 = vcombine.high %v224_v0, %v232_v1 }
  0x3f   :  { %1031 = vmatprep.subr.bf16.mxu0 %v1364_v22  ;;  %v144_v22 = vld [vmem:[%s2082_s3 + $0x20] sm:$0xff] }
  0xf4   :  { %v1658_v34 = vpop.f32.mrb[0].mxu0 }
  0xf5   :  { %v1512_v35 = vpop.f32.mrb[1].mxu0  ;;  %v123_v36 = vmul.f32 %v1658_v34, %v1658_v34 }
  0xf6   :  { %v120_v37 = vpop.f32.mrb[2].mxu0 }
  0xf7   :  { %v1513_v38 = vpop.f32.mrb[3].mxu0  ;;  %124 = vadd.xlane.f32.xlu0 %v123_v36  ;;  %v1380_v37 = vcombine.high %v159_v32, %v167_v33  ;;  %v168_v32 = vld [vmem:[%s2082_s3 + $0xe0] sm:$0xff]  ;;  %v161_v33 = vld [vmem:[%s2082_s3 + $0xa8] sm:$0xff] }
  0xf8   :  { %v174_v38 = vld [vmem:[%s2082_s3 + $0x110] sm:$0xff] }
  0xf9   :  { %v1394_v44 = vcombine.high %v174_v38, %v182_v39  ;;  %v1393_v50 = vcombine.low %v174_v38, %v182_v39 }
 0x184   :  { %v125_v24 = vpop.xlane.xlu0 %124 }
 0x185   :  { %v127_v25 = vmul.f32 0.0078125, %v125_v24  ;;  %v152_v24 = vld [vmem:[%s2082_s3 + $0x60] sm:$0xff] }
 0x187   :  { %v128_v26 = vadd.f32 1e-06, %v127_v25  ;;  %v145_v25 = vld [vmem:[%s2082_s3 + $0x28] sm:$0xff] }
 0x189   :  { %1525 = vrsqrt.f32 %v128_v26  ;;  %v153_v26 = vld [vmem:[%s2082_s3 + $0x68] sm:$0xff] }
 0x193   :  { %v1526_v27 = vpop.eup %1525 }
 0x194   :  { %v130_v29 = vmul.f32 %v1526_v27, %v1658_v34  ;;  %v1378_v34 = vcombine.high %v158_v30, %v166_v31  ;;  %v1473_v27 = vcombine.low %v254_v14, %v262_v15  ;;  %v1368_v30 = vcombine.high %v145_v25, %v153_v26  ;;  %v160_v31 = vld [vmem:[%s2082_s3 + $0xa0] sm:$0xff] }
 0x195   :  { %v1382_v38 = vcombine.high %v160_v31, %v168_v32 }
 0x196   :  { %v138_v35 = vmul.f32 %v1356_v28, %v130_v29  ;;  %v1475_v28 = vcombine.low %v255_v16, %v263_v17  ;;  %v1366_v29 = vcombine.high %v144_v22, %v152_v24 }
 0x198   :  { %v1752_v36 = vpack.c.bf16 %v138_v35, %v138_v35  ;;  %v169_v35 = vld [vmem:[%s2082_s3 + $0xe8] sm:$0xff] }
 0x199   :  { %v1384_v39 = vcombine.high %v161_v33, %v169_v35 }
 0x19a   :  { %941 = vmatmul.mubr.bf16.vlgmr.msra.gmra.mrb[0].mxu1 %v1752_v36  ;;  %982 = vmatmul.mubr.bf16.vlgmr.msra.gmra.mrb[4].mxu0 %v1752_v36 }
 0x19b   :  { %991 = vmatpush1.bf16.msra.mxu1 %v1361_v20  ;;  %1032 = vmatpush1.bf16.msra.mxu0 %v1363_v21  ;;  %v1474_v20 = vcombine.high %v254_v14, %v262_v15  ;;  %v1476_v21 = vcombine.high %v255_v16, %v263_v17  ;;  %v1462_v14 = vcombine.high %v240_v8, %v248_v9  ;;  %v256_v16 = vld [vmem:[%s2082_s3 + $0x3a0] sm:$0xff] }
 0x19c   :  { %992 = vmatprep.subr.bf16.mxu1 %v1378_v34  ;;  %1033 = vmatprep.subr.bf16.mxu0 %v1380_v37  ;;  %v1365_v34 = vcombine.low %v144_v22, %v152_v24  ;;  %v1367_v37 = vcombine.low %v145_v25, %v153_v26  ;;  %v264_v17 = vld [vmem:[%s2082_s3 + $0x3e0] sm:$0xff]  ;;  %v146_v25 = vld [vmem:[%s2082_s3 + $0x30] sm:$0xff] }
 0x19d   :  { %1022 = vmatprep.mubr.bf16.mxu1 %v1569_v23  ;;  %1063 = vmatprep.mubr.bf16.mxu0 %v1569_v23  ;;  %v1478_v22 = vcombine.high %v256_v16, %v264_v17  ;;  %v154_v26 = vld [vmem:[%s2082_s3 + $0x70] sm:$0xff] }
 0x19f   :  { %993 = vmatpush1.bf16.msra.mxu1 %v1377_v42  ;;  %1034 = vmatpush1.bf16.msra.mxu0 %v1379_v43  ;;  %v177_v42 = vld [vmem:[%s2082_s3 + $0x128] sm:$0xff] }
 0x1a0   :  { %994 = vmatprep.subr.bf16.mxu1 %v1394_v44  ;;  %1035 = vmatprep.subr.bf16.mxu0 %v1396_v45  ;;  %v185_v43 = vld [vmem:[%s2082_s3 + $0x168] sm:$0xff]  ;;  %v1381_v44 = vcombine.low %v160_v31, %v168_v32  ;;  %v1383_v45 = vcombine.low %v161_v33, %v169_v35  ;;  %v1370_v31 = vcombine.high %v146_v25, %v154_v26  ;;  %v162_v33 = vld [vmem:[%s2082_s3 + $0xb0] sm:$0xff] }
 0x1a1   :  { %v1400_v47 = vcombine.high %v177_v42, %v185_v43  ;;  %v170_v35 = vld [vmem:[%s2082_s3 + $0xf0] sm:$0xff] }
 0x1a3   :  { %995 = vmatpush1.bf16.msra.mxu1 %v1393_v50  ;;  %1036 = vmatpush1.bf16.msra.mxu0 %v1395_v51  ;;  %v193_v50 = vld [vmem:[%s2082_s3 + $0x1a8] sm:$0xff] }
 0x1a4   :  { %996 = vmatprep.subr.bf16.mxu1 %v1410_v52  ;;  %1037 = vmatprep.subr.bf16.mxu0 %v1412_v53  ;;  %v201_v51 = vld [vmem:[%s2082_s3 + $0x1e8] sm:$0xff]  ;;  %v1397_v52 = vcombine.low %v176_v40, %v184_v41  ;;  %v1399_v53 = vcombine.low %v177_v42, %v185_v43  ;;  %v1386_v40 = vcombine.high %v162_v33, %v170_v35  ;;  %v178_v42 = vld [vmem:[%s2082_s3 + $0x130] sm:$0xff] }
 0x1a5   :  { %v1416_v55 = vcombine.high %v193_v50, %v201_v51  ;;  %v186_v43 = vld [vmem:[%s2082_s3 + $0x170] sm:$0xff] }
 0x1a7   :  { %997 = vmatpush1.bf16.msra.mxu1 %v1409_v58  ;;  %1038 = vmatpush1.bf16.msra.mxu0 %v1411_v59  ;;  %v209_v58 = vld [vmem:[%s2082_s3 + $0x228] sm:$0xff] }
 0x1a8   :  { %998 = vmatprep.subr.bf16.mxu1 %v1426_v60  ;;  %1039 = vmatprep.subr.bf16.mxu0 %v1428_v61  ;;  %v217_v59 = vld [vmem:[%s2082_s3 + $0x268] sm:$0xff]  ;;  %v1413_v60 = vcombine.low %v192_v48, %v200_v49  ;;  %v1415_v61 = vcombine.low %v193_v50, %v201_v51  ;;  %v1402_v48 = vcombine.high %v178_v42, %v186_v43  ;;  %v194_v50 = vld [vmem:[%s2082_s3 + $0x1b0] sm:$0xff] }
 0x1a9   :  { %v1432_v63 = vcombine.high %v209_v58, %v217_v59  ;;  %v202_v51 = vld [vmem:[%s2082_s3 + $0x1f0] sm:$0xff] }
 0x1ab   :  { %999 = vmatpush1.bf16.msra.mxu1 %v1425_v2  ;;  %1040 = vmatpush1.bf16.msra.mxu0 %v1427_v3  ;;  %v225_v2 = vld [vmem:[%s2082_s3 + $0x2a8] sm:$0xff] }
 0x1ac   :  { %1000 = vmatprep.subr.bf16.mxu1 %v1442_v4  ;;  %1041 = vmatprep.subr.bf16.mxu0 %v1444_v5  ;;  %v233_v3 = vld [vmem:[%s2082_s3 + $0x2e8] sm:$0xff]  ;;  %v1429_v4 = vcombine.low %v208_v56, %v216_v57  ;;  %v1431_v5 = vcombine.low %v209_v58, %v217_v59  ;;  %v1418_v56 = vcombine.high %v194_v50, %v202_v51  ;;  %v210_v58 = vld [vmem:[%s2082_s3 + $0x230] sm:$0xff] }
 0x1ad   :  { %v1448_v7 = vcombine.high %v225_v2, %v233_v3  ;;  %v218_v59 = vld [vmem:[%s2082_s3 + $0x270] sm:$0xff] }
 0x1af   :  { %1001 = vmatpush1.bf16.msra.mxu1 %v1441_v10  ;;  %1042 = vmatpush1.bf16.msra.mxu0 %v1443_v11  ;;  %v241_v10 = vld [vmem:[%s2082_s3 + $0x328] sm:$0xff] }
 0x1b0   :  { %1002 = vmatprep.subr.bf16.mxu1 %v1458_v12  ;;  %1043 = vmatprep.subr.bf16.mxu0 %v1460_v13  ;;  %v249_v11 = vld [vmem:[%s2082_s3 + $0x368] sm:$0xff]  ;;  %v1445_v12 = vcombine.low %v224_v0, %v232_v1  ;;  %v1447_v13 = vcombine.low %v225_v2, %v233_v3  ;;  %v226_v1 = vld [vmem:[%s2082_s3 + $0x2b0] sm:$0xff]  ;;  %v227_v3 = vld [vmem:[%s2082_s3 + $0x2b8] sm:$0xff] }
 0x1b1   :  { %v1464_v15 = vcombine.high %v241_v10, %v249_v11  ;;  %v234_v2 = vld [vmem:[%s2082_s3 + $0x2f0] sm:$0xff] }
 0x1b3   :  { %1003 = vmatpush1.bf16.msra.mxu1 %v1457_v18  ;;  %1044 = vmatpush1.bf16.msra.mxu0 %v1459_v19  ;;  %v257_v18 = vld [vmem:[%s2082_s3 + $0x3a8] sm:$0xff] }
 0x1b4   :  { %1004 = vmatprep.subr.bf16.mxu1 %v1474_v20  ;;  %1045 = vmatprep.subr.bf16.mxu0 %v1476_v21  ;;  %v265_v19 = vld [vmem:[%s2082_s3 + $0x3e8] sm:$0xff]  ;;  %v1461_v20 = vcombine.low %v240_v8, %v248_v9  ;;  %v1463_v21 = vcombine.low %v241_v10, %v249_v11  ;;  %v242_v9 = vld [vmem:[%s2082_s3 + $0x330] sm:$0xff]  ;;  %v243_v11 = vld [vmem:[%s2082_s3 + $0x338] sm:$0xff] }
 0x1b5   :  { %v1480_v24 = vcombine.high %v257_v18, %v265_v19  ;;  %v250_v10 = vld [vmem:[%s2082_s3 + $0x370] sm:$0xff] }
 0x1b7   :  { %1005 = vmatpush1.bf16.msra.mxu1 %v1473_v27  ;;  %1046 = vmatpush1.bf16.msra.mxu0 %v1475_v28  ;;  %v147_v27 = vld [vmem:[%s2082_s3 + $0x38] sm:$0xff] }
 0x1b8   :  { %1072 = vmatprep.subr.bf16.mxu1 %v1366_v29  ;;  %1113 = vmatprep.subr.bf16.mxu0 %v1368_v30  ;;  %v155_v28 = vld [vmem:[%s2082_s3 + $0x78] sm:$0xff]  ;;  %v1477_v29 = vcombine.low %v256_v16, %v264_v17  ;;  %v1479_v30 = vcombine.low %v257_v18, %v265_v19  ;;  %v258_v17 = vld [vmem:[%s2082_s3 + $0x3b0] sm:$0xff] }
 0x1b9   :  { %v1372_v32 = vcombine.high %v147_v27, %v155_v28  ;;  %v266_v18 = vld [vmem:[%s2082_s3 + $0x3f0] sm:$0xff]  ;;  %v259_v19 = vld [vmem:[%s2082_s3 + $0x3b8] sm:$0xff] }
 0x1ba   :  { %1023 = vmatmul.mubr.bf16.vlgmr.msra.gmra.mrb[4].mxu1 %v1752_v36  ;;  %1064 = vmatmul.mubr.bf16.vlgmr.msra.gmra.mrb[8].mxu0 %v1752_v36 }
 0x1bb   :  { %1073 = vmatpush1.bf16.msra.mxu1 %v1365_v34  ;;  %1114 = vmatpush1.bf16.msra.mxu0 %v1367_v37  ;;  %v163_v34 = vld [vmem:[%s2082_s3 + $0xb8] sm:$0xff] }
 0x1bc   :  { %1074 = vmatprep.subr.bf16.mxu1 %v1382_v38  ;;  %1115 = vmatprep.subr.bf16.mxu0 %v1384_v39  ;;  %v171_v37 = vld [vmem:[%s2082_s3 + $0xf8] sm:$0xff]  ;;  %v1369_v38 = vcombine.low %v146_v25, %v154_v26  ;;  %v1371_v39 = vcombine.low %v147_v27, %v155_v28  ;;  %v1481_v26 = vcombine.low %v258_v17, %v266_v18 }
 0x1bd   :  { %1104 = vmatprep.mubr.bf16.mxu1 %v1569_v23  ;;  %1145 = vmatprep.mubr.bf16.mxu0 %v1569_v23  ;;  %v1388_v41 = vcombine.high %v163_v34, %v171_v37 }
 0x1bf   :  { %1075 = vmatpush1.bf16.msra.mxu1 %v1381_v44  ;;  %1116 = vmatpush1.bf16.msra.mxu0 %v1383_v45  ;;  %v179_v44 = vld [vmem:[%s2082_s3 + $0x138] sm:$0xff] }
 0x1c0   :  { %1076 = vmatprep.subr.bf16.mxu1 %v1398_v46  ;;  %1117 = vmatprep.subr.bf16.mxu0 %v1400_v47  ;;  %v187_v45 = vld [vmem:[%s2082_s3 + $0x178] sm:$0xff]  ;;  %v1385_v46 = vcombine.low %v162_v33, %v170_v35  ;;  %v1387_v47 = vcombine.low %v163_v34, %v171_v37 }
 0x1c1   :  { %v1404_v49 = vcombine.high %v179_v44, %v187_v45 }
 0x1c3   :  { %1077 = vmatpush1.bf16.msra.mxu1 %v1397_v52  ;;  %1118 = vmatpush1.bf16.msra.mxu0 %v1399_v53  ;;  %v195_v52 = vld [vmem:[%s2082_s3 + $0x1b8] sm:$0xff] }
 0x1c4   :  { %1078 = vmatprep.subr.bf16.mxu1 %v1414_v54  ;;  %1119 = vmatprep.subr.bf16.mxu0 %v1416_v55  ;;  %v203_v53 = vld [vmem:[%s2082_s3 + $0x1f8] sm:$0xff]  ;;  %v1401_v54 = vcombine.low %v178_v42, %v186_v43  ;;  %v1403_v55 = vcombine.low %v179_v44, %v187_v45 }
 0x1c5   :  { %v1420_v57 = vcombine.high %v195_v52, %v203_v53 }
 0x1c7   :  { %1079 = vmatpush1.bf16.msra.mxu1 %v1413_v60  ;;  %1120 = vmatpush1.bf16.msra.mxu0 %v1415_v61  ;;  %v219_v60 = vld [vmem:[%s2082_s3 + $0x278] sm:$0xff]  ;;  %v1417_v61 = vcombine.low %v194_v50, %v202_v51 }
 0x1c8   :  { %1080 = vmatprep.subr.bf16.mxu1 %v1430_v62  ;;  %1121 = vmatprep.subr.bf16.mxu0 %v1432_v63  ;;  %v1419_v62 = vcombine.low %v195_v52, %v203_v53  ;;  %v1434_v63 = vcombine.high %v210_v58, %v218_v59 }
 0x1cb   :  { %1081 = vmatpush1.bf16.msra.mxu1 %v1429_v4  ;;  %1122 = vmatpush1.bf16.msra.mxu0 %v1431_v5  ;;  %v235_v4 = vld [vmem:[%s2082_s3 + $0x2f8] sm:$0xff]  ;;  %v1433_v5 = vcombine.low %v210_v58, %v218_v59 }
 0x1cc   :  { %1082 = vmatprep.subr.bf16.mxu1 %v1446_v6  ;;  %1123 = vmatprep.subr.bf16.mxu0 %v1448_v7  ;;  %v1450_v7 = vcombine.high %v226_v1, %v234_v2  ;;  %v1452_v8 = vcombine.high %v227_v3, %v235_v4 }
 0x1cf   :  { %1083 = vmatpush1.bf16.msra.mxu1 %v1445_v12  ;;  %1124 = vmatpush1.bf16.msra.mxu0 %v1447_v13  ;;  %v251_v12 = vld [vmem:[%s2082_s3 + $0x378] sm:$0xff]  ;;  %v1449_v13 = vcombine.low %v226_v1, %v234_v2 }
 0x1d0   :  { %1084 = vmatprep.subr.bf16.mxu1 %v1462_v14  ;;  %1125 = vmatprep.subr.bf16.mxu0 %v1464_v15  ;;  %v1451_v14 = vcombine.low %v227_v3, %v235_v4  ;;  %v1466_v15 = vcombine.high %v242_v9, %v250_v10  ;;  %v1468_v16 = vcombine.high %v243_v11, %v251_v12 }
 0x1d3   :  { %1085 = vmatpush1.bf16.msra.mxu1 %v1461_v20  ;;  %1126 = vmatpush1.bf16.msra.mxu0 %v1463_v21  ;;  %v267_v20 = vld [vmem:[%s2082_s3 + $0x3f8] sm:$0xff]  ;;  %v1465_v21 = vcombine.low %v242_v9, %v250_v10 }
 0x1d4   :  { %1086 = vmatprep.subr.bf16.mxu1 %v1478_v22  ;;  %1127 = vmatprep.subr.bf16.mxu0 %v1480_v24  ;;  %v1467_v22 = vcombine.low %v243_v11, %v251_v12  ;;  %v1482_v24 = vcombine.high %v258_v17, %v266_v18  ;;  %v1484_v25 = vcombine.high %v259_v19, %v267_v20 }
 0x1d5   :  { %v1483_v27 = vcombine.low %v259_v19, %v267_v20 }
 0x1d7   :  { %1087 = vmatpush1.bf16.msra.mxu1 %v1477_v29  ;;  %1128 = vmatpush1.bf16.msra.mxu0 %v1479_v30 }
 0x1d8   :  { %1154 = vmatprep.subr.bf16.mxu1 %v1370_v31  ;;  %1195 = vmatprep.subr.bf16.mxu0 %v1372_v32 }
 0x1da   :  { %1105 = vmatmul.mubr.bf16.vlgmr.msra.gmra.mrb[8].mxu1 %v1752_v36  ;;  %1146 = vmatmul.mubr.bf16.vlgmr.msra.gmra.mrb[12].mxu0 %v1752_v36 }
 0x1db   :  { %1155 = vmatpush1.bf16.msra.mxu1 %v1369_v38  ;;  %1196 = vmatpush1.bf16.msra.mxu0 %v1371_v39 }
 0x1dc   :  { %1156 = vmatprep.subr.bf16.mxu1 %v1386_v40  ;;  %1197 = vmatprep.subr.bf16.mxu0 %v1388_v41 }
 0x1dd   :  { %1186 = vmatprep.mubr.bf16.mxu1 %v1569_v23  ;;  %1227 = vmatprep.mubr.bf16.mxu0 %v1569_v23  ;;  %v211_v23 = vld [vmem:[%s2082_s3 + $0x238] sm:$0xff] }
 0x1de   :  { %v1436_v0 = vcombine.high %v211_v23, %v219_v60  ;;  %v1435_v6 = vcombine.low %v211_v23, %v219_v60 }
 0x1df   :  { %1157 = vmatpush1.bf16.msra.mxu1 %v1385_v46  ;;  %1198 = vmatpush1.bf16.msra.mxu0 %v1387_v47 }
 0x1e0   :  { %1158 = vmatprep.subr.bf16.mxu1 %v1402_v48  ;;  %1199 = vmatprep.subr.bf16.mxu0 %v1404_v49 }
 0x1e3   :  { %1159 = vmatpush1.bf16.msra.mxu1 %v1401_v54  ;;  %1200 = vmatpush1.bf16.msra.mxu0 %v1403_v55 }
 0x1e4   :  { %1160 = vmatprep.subr.bf16.mxu1 %v1418_v56  ;;  %1201 = vmatprep.subr.bf16.mxu0 %v1420_v57 }
 0x1e7   :  { %1161 = vmatpush1.bf16.msra.mxu1 %v1417_v61  ;;  %1202 = vmatpush1.bf16.msra.mxu0 %v1419_v62 }
 0x1e8   :  { %1162 = vmatprep.subr.bf16.mxu1 %v1434_v63  ;;  %1203 = vmatprep.subr.bf16.mxu0 %v1436_v0 }
 0x1eb   :  { %1163 = vmatpush1.bf16.msra.mxu1 %v1433_v5  ;;  %1204 = vmatpush1.bf16.msra.mxu0 %v1435_v6 }
 0x1ec   :  { %1164 = vmatprep.subr.bf16.mxu1 %v1450_v7  ;;  %1205 = vmatprep.subr.bf16.mxu0 %v1452_v8 }
 0x1ef   :  { %1165 = vmatpush1.bf16.msra.mxu1 %v1449_v13  ;;  %1206 = vmatpush1.bf16.msra.mxu0 %v1451_v14 }
 0x1f0   :  { %1166 = vmatprep.subr.bf16.mxu1 %v1466_v15  ;;  %1207 = vmatprep.subr.bf16.mxu0 %v1468_v16 }
 0x1f3   :  { %1167 = vmatpush1.bf16.msra.mxu1 %v1465_v21  ;;  %1208 = vmatpush1.bf16.msra.mxu0 %v1467_v22 }
 0x1f4   :  { %1168 = vmatprep.subr.bf16.mxu1 %v1482_v24  ;;  %1209 = vmatprep.subr.bf16.mxu0 %v1484_v25 }
 0x1f7   :  { %1169 = vmatpush1.bf16.msra.mxu1 %v1481_v26  ;;  %1210 = vmatpush1.bf16.msra.mxu0 %v1483_v27 }
 0x1fa   :  { %1187 = vmatmul.mubr.bf16.vlgmr.msra.gmra.mrb[12].mxu1 %v1752_v36  ;;  %1228 = vmatmul.mubr.bf16.vlgmr.msra.gmra.mrb[16].mxu0 %v1752_v36 }
 0x26d   :  { %v942_v28 = vpop.f32.mrb[0].mxu1  ;;  %v983_v29 = vpop.f32.mrb[4].mxu0 }
 0x26e   :  { %v944_v30 = vpop.f32.mrb[1].mxu1  ;;  %v985_v31 = vpop.f32.mrb[5].mxu0 }
 0x26f   :  { %v1236_v32 = vmax.f32 %v942_v28, %v944_v30  ;;  %v946_v33 = vpop.f32.mrb[2].mxu1  ;;  %v987_v35 = vpop.f32.mrb[6].mxu0 }
 0x270   :  { %v947_v34 = vpop.f32.mrb[3].mxu1  ;;  %v988_v37 = vpop.f32.mrb[7].mxu0 }
 0x271   :  { %v1237_v38 = vmax.f32 %v1236_v32, %v983_v29 }
 0x273   :  { %v1238_v39 = vmax.f32 %v1237_v38, %v985_v31 }
 0x275   :  { %v1239_v40 = vsub.f32 %v942_v28, %v1238_v39  ;;  %v1242_v41 = vsub.f32 %v944_v30, %v1238_v39  ;;  %v1245_v42 = vsub.f32 %v983_v29, %v1238_v39  ;;  %v1248_v43 = vsub.f32 %v985_v31, %v1238_v39 }
 0x277   :  { %v1240_v44 = vmul.f32 1.442695, %v1239_v40  ;;  %v1243_v45 = vmul.f32 1.442695, %v1242_v41  ;;  %v1246_v46 = vmul.f32 1.442695, %v1245_v42 }
 0x278   :  { %v1249_v36 = vmul.f32 1.442695, %v1248_v43 }
 0x279   :  { %1527 = vpow2.f32 %v1240_v44 }
 0x27a   :  { %1529 = vpow2.f32 %v1243_v45 }
 0x27b   :  { %1531 = vpow2.f32 %v1246_v46 }
 0x27c   :  { %1533 = vpow2.f32 %v1249_v36 }
 0x283   :  { %v1528_v47 = vpop.eup %1527 }
 0x284   :  { %v1530_v48 = vpop.eup %1529 }
 0x285   :  { %v1251_v49 = vadd.f32 %v1530_v48, %v1528_v47  ;;  %v1532_v50 = vpop.eup %1531 }
 0x286   :  { %v1534_v52 = vpop.eup %1533 }
 0x287   :  { %v1252_v51 = vadd.f32 %v1532_v50, %v1251_v49 }
 0x289   :  { %v1253_v53 = vadd.f32 %v1534_v52, %v1252_v51 }
 0x28b   :  { %1535 = vrcp.f32 %v1253_v53 }
 0x28d   :  { %v1024_v54 = vpop.f32.mrb[4].mxu1  ;;  %v1065_v55 = vpop.f32.mrb[8].mxu0 }
 0x28e   :  { %v1026_v56 = vpop.f32.mrb[5].mxu1  ;;  %v1067_v57 = vpop.f32.mrb[9].mxu0 }
 0x28f   :  { %v1263_v58 = vmax.f32 %v1024_v54, %v1026_v56  ;;  %v1028_v59 = vpop.f32.mrb[6].mxu1  ;;  %v1069_v23 = vpop.f32.mrb[10].mxu0 }
 0x290   :  { %v1029_v60 = vpop.f32.mrb[7].mxu1  ;;  %v1070_v61 = vpop.f32.mrb[11].mxu0 }
 0x291   :  { %v1264_v62 = vmax.f32 %v1263_v58, %v1065_v55 }
 0x293   :  { %v1265_v63 = vmax.f32 %v1264_v62, %v1067_v57 }
 0x295   :  { %v1536_v0 = vpop.eup %1535  ;;  %v1266_v1 = vsub.f32 %v1024_v54, %v1265_v63  ;;  %v1269_v2 = vsub.f32 %v1026_v56, %v1265_v63  ;;  %v1272_v3 = vsub.f32 %v1065_v55, %v1265_v63  ;;  %v1275_v4 = vsub.f32 %v1067_v57, %v1265_v63 }
 0x296   :  { %v1255_v5 = vmul.f32 %v1536_v0, %v1528_v47  ;;  %v1257_v6 = vmul.f32 %v1536_v0, %v1530_v48  ;;  %v1259_v7 = vmul.f32 %v1536_v0, %v1532_v50  ;;  %v1261_v8 = vmul.f32 %v1536_v0, %v1534_v52 }
 0x297   :  { %v1267_v9 = vmul.f32 1.442695, %v1266_v1  ;;  %v1270_v10 = vmul.f32 1.442695, %v1269_v2  ;;  %v1273_v11 = vmul.f32 1.442695, %v1272_v3 }
 0x298   :  { %1256 = vst [vmem:[%s2084_s4] sm:$0xff] %v1255_v5  ;;  %1258 = vst [vmem:[%s2084_s4 + $0x8] sm:$0xff] %v1257_v6  ;;  %v1276_v12 = vmul.f32 1.442695, %v1275_v4 }
 0x299   :  { %1260 = vst [vmem:[%s2084_s4 + $0x10] sm:$0xff] %v1259_v7  ;;  %1262 = vst [vmem:[%s2084_s4 + $0x18] sm:$0xff] %v1261_v8  ;;  %1537 = vpow2.f32 %v1267_v9 }
 0x29a   :  { %1539 = vpow2.f32 %v1270_v10 }
 0x29b   :  { %1541 = vpow2.f32 %v1273_v11 }
 0x29c   :  { %1543 = vpow2.f32 %v1276_v12 }
 0x2a3   :  { %v1538_v13 = vpop.eup %1537 }
 0x2a4   :  { %v1540_v14 = vpop.eup %1539 }
 0x2a5   :  { %v1278_v15 = vadd.f32 %v1540_v14, %v1538_v13  ;;  %v1542_v16 = vpop.eup %1541 }
 0x2a6   :  { %v1544_v18 = vpop.eup %1543 }
 0x2a7   :  { %v1279_v17 = vadd.f32 %v1542_v16, %v1278_v15 }
 0x2a9   :  { %v1280_v19 = vadd.f32 %v1544_v18, %v1279_v17 }
 0x2ab   :  { %1545 = vrcp.f32 %v1280_v19 }
 0x2ad   :  { %v1106_v20 = vpop.f32.mrb[8].mxu1  ;;  %v1147_v21 = vpop.f32.mrb[12].mxu0 }
 0x2ae   :  { %v1108_v22 = vpop.f32.mrb[9].mxu1  ;;  %v1149_v24 = vpop.f32.mrb[13].mxu0 }
 0x2af   :  { %v1290_v25 = vmax.f32 %v1106_v20, %v1108_v22  ;;  %v1110_v26 = vpop.f32.mrb[10].mxu1  ;;  %v1151_v27 = vpop.f32.mrb[14].mxu0 }
 0x2b0   :  { %v1111_v28 = vpop.f32.mrb[11].mxu1  ;;  %v1152_v29 = vpop.f32.mrb[15].mxu0 }
 0x2b1   :  { %v1291_v30 = vmax.f32 %v1290_v25, %v1147_v21 }
 0x2b3   :  { %v1292_v31 = vmax.f32 %v1291_v30, %v1149_v24 }
 0x2b5   :  { %v1546_v32 = vpop.eup %1545  ;;  %v1293_v33 = vsub.f32 %v1106_v20, %v1292_v31  ;;  %v1296_v35 = vsub.f32 %v1108_v22, %v1292_v31  ;;  %v1299_v34 = vsub.f32 %v1147_v21, %v1292_v31  ;;  %v1302_v37 = vsub.f32 %v1149_v24, %v1292_v31 }
 0x2b6   :  { %v1282_v38 = vmul.f32 %v1546_v32, %v1538_v13  ;;  %v1284_v39 = vmul.f32 %v1546_v32, %v1540_v14  ;;  %v1286_v40 = vmul.f32 %v1546_v32, %v1542_v16  ;;  %v1288_v41 = vmul.f32 %v1546_v32, %v1544_v18 }
 0x2b7   :  { %v1294_v42 = vmul.f32 1.442695, %v1293_v33  ;;  %v1297_v43 = vmul.f32 1.442695, %v1296_v35  ;;  %v1300_v44 = vmul.f32 1.442695, %v1299_v34 }
 0x2b8   :  { %1283 = vst [vmem:[%s2084_s4 + $0x20] sm:$0xff] %v1282_v38  ;;  %1285 = vst [vmem:[%s2084_s4 + $0x28] sm:$0xff] %v1284_v39  ;;  %v1303_v45 = vmul.f32 1.442695, %v1302_v37 }
 0x2b9   :  { %1287 = vst [vmem:[%s2084_s4 + $0x30] sm:$0xff] %v1286_v40  ;;  %1289 = vst [vmem:[%s2084_s4 + $0x38] sm:$0xff] %v1288_v41  ;;  %1547 = vpow2.f32 %v1294_v42 }
 0x2ba   :  { %1549 = vpow2.f32 %v1297_v43 }
 0x2bb   :  { %1551 = vpow2.f32 %v1300_v44 }
 0x2bc   :  { %1553 = vpow2.f32 %v1303_v45 }
 0x2c3   :  { %v1548_v46 = vpop.eup %1547 }
 0x2c4   :  { %v1550_v36 = vpop.eup %1549 }
 0x2c5   :  { %v1305_v47 = vadd.f32 %v1550_v36, %v1548_v46  ;;  %v1552_v48 = vpop.eup %1551 }
 0x2c6   :  { %v1554_v50 = vpop.eup %1553 }
 0x2c7   :  { %v1306_v49 = vadd.f32 %v1552_v48, %v1305_v47 }
 0x2c9   :  { %v1307_v51 = vadd.f32 %v1554_v50, %v1306_v49 }
 0x2cb   :  { %1555 = vrcp.f32 %v1307_v51 }
 0x2cd   :  { %v1188_v52 = vpop.f32.mrb[12].mxu1  ;;  %v1229_v53 = vpop.f32.mrb[16].mxu0 }
 0x2ce   :  { %v1190_v54 = vpop.f32.mrb[13].mxu1  ;;  %v1231_v55 = vpop.f32.mrb[17].mxu0 }
 0x2cf   :  { %v1317_v56 = vmax.f32 %v1188_v52, %v1190_v54  ;;  %v1192_v57 = vpop.f32.mrb[14].mxu1  ;;  %v1233_v58 = vpop.f32.mrb[18].mxu0 }
 0x2d0   :  { %v1193_v59 = vpop.f32.mrb[15].mxu1  ;;  %v1234_v23 = vpop.f32.mrb[19].mxu0 }
 0x2d1   :  { %v1318_v60 = vmax.f32 %v1317_v56, %v1229_v53 }
 0x2d3   :  { %v1319_v61 = vmax.f32 %v1318_v60, %v1231_v55 }
 0x2d5   :  { %v1556_v62 = vpop.eup %1555  ;;  %v1320_v63 = vsub.f32 %v1188_v52, %v1319_v61  ;;  %v1323_v0 = vsub.f32 %v1190_v54, %v1319_v61  ;;  %v1326_v1 = vsub.f32 %v1229_v53, %v1319_v61  ;;  %v1329_v2 = vsub.f32 %v1231_v55, %v1319_v61 }
 0x2d6   :  { %v1309_v3 = vmul.f32 %v1556_v62, %v1548_v46  ;;  %v1311_v4 = vmul.f32 %v1556_v62, %v1550_v36  ;;  %v1313_v5 = vmul.f32 %v1556_v62, %v1552_v48  ;;  %v1315_v6 = vmul.f32 %v1556_v62, %v1554_v50 }
 0x2d7   :  { %v1321_v7 = vmul.f32 1.442695, %v1320_v63  ;;  %v1324_v8 = vmul.f32 1.442695, %v1323_v0  ;;  %v1327_v9 = vmul.f32 1.442695, %v1326_v1 }
 0x2d8   :  { %1310 = vst [vmem:[%s2084_s4 + $0x40] sm:$0xff] %v1309_v3  ;;  %1312 = vst [vmem:[%s2084_s4 + $0x48] sm:$0xff] %v1311_v4  ;;  %v1330_v10 = vmul.f32 1.442695, %v1329_v2 }
 0x2d9   :  { %1314 = vst [vmem:[%s2084_s4 + $0x50] sm:$0xff] %v1313_v5  ;;  %1316 = vst [vmem:[%s2084_s4 + $0x58] sm:$0xff] %v1315_v6  ;;  %1557 = vpow2.f32 %v1321_v7 }
 0x2da   :  { %1559 = vpow2.f32 %v1324_v8 }
 0x2db   :  { %1561 = vpow2.f32 %v1327_v9 }
 0x2dc   :  { %1563 = vpow2.f32 %v1330_v10 }
 0x2e3   :  { %v1558_v11 = vpop.eup %1557 }
 0x2e4   :  { %v1560_v12 = vpop.eup %1559 }
 0x2e5   :  { %v1332_v13 = vadd.f32 %v1560_v12, %v1558_v11  ;;  %v1562_v14 = vpop.eup %1561 }
 0x2e6   :  { %v1564_v16 = vpop.eup %1563 }
 0x2e7   :  { %v1333_v15 = vadd.f32 %v1562_v14, %v1332_v13 }
 0x2e9   :  { %v1334_v17 = vadd.f32 %v1564_v16, %v1333_v15 }
 0x2eb   :  { %1565 = vrcp.f32 %v1334_v17 }
 0x2f5   :  { %v1566_v18 = vpop.eup %1565 }
 0x2f6   :  { %v1336_v19 = vmul.f32 %v1566_v18, %v1558_v11  ;;  %v1338_v20 = vmul.f32 %v1566_v18, %v1560_v12  ;;  %v1340_v21 = vmul.f32 %v1566_v18, %v1562_v14  ;;  %v1342_v22 = vmul.f32 %v1566_v18, %v1564_v16 }
 0x2f8   :  { %1337 = vst [vmem:[%s2084_s4 + $0x60] sm:$0xff] %v1336_v19  ;;  %1339 = vst [vmem:[%s2084_s4 + $0x68] sm:$0xff] %v1338_v20 }
 0x2f9   :  { %1341 = vst [vmem:[%s2084_s4 + $0x70] sm:$0xff] %v1340_v21  ;;  %1343 = vst [vmem:[%s2084_s4 + $0x78] sm:$0xff] %v1342_v22 }

</bundles_post_ra>
